<compile_context>
chip_gen: v7x
topology: tpu7x:2x2x1
jax: 0.10.0
libtpu: 0.0.40
codegen_flags: <defaults>
</compile_context>

<pallas_src>
import math

import jax
import jax.numpy as jnp
from jax import lax
from jax.experimental import pallas as pl
from jax.experimental.pallas import tpu as pltpu

# ----- model configuration (CNN_encoder defaults) -----
INPUT_SIZE = 19                      # number of coordinate deltas (coords has INPUT_SIZE+1 points)
INPUT_DIM = 2
WIDTHS = [64, 64, 128, 128, 256]
STRIDES = [1, 1, 2, 2, 1]
CIN = [INPUT_DIM] + WIDTHS[:-1]
COUT = WIDTHS
BN_EPS = 1e-5


def _seq_lengths():
    lens = [INPUT_SIZE]
    l = INPUT_SIZE
    for s in STRIDES:
        l = (l - 3) // s + 1         # valid conv, kernel 3
        lens.append(l)
    return lens


LENS = _seq_lengths()                # [19, 17, 15, 7, 3, 1]
FC_SIZE = LENS[-1] * COUT[-1]        # 1 * 256 = 256 (matches module's printed fc_size)

# packed bf16 weight slab layout (rows = flattened (tap, Cin), lanes = Cout)
W_OFFS = []
_off = 0
for _i in range(1, len(WIDTHS)):
    W_OFFS.append(_off)
    _off += 3 * CIN[_i]
WPK_ROWS = _off                      # 192 + 192 + 384 + 384 = 1152
P_ROWS = 16                          # rows 0..4: biases, 5: final scale, 6: final shift, 8..15: layer-0 weight (K padded to 8)


# ----- Pallas kernel -----
def cnn_encoder_kernel(x0_ref, w_ref, p_ref, out_ref):
    """x0_ref: (LENS[1]*B_pad, 8) f32 layer-0 im2col slab (K padded 6->8), rows t-major, batch inner.
    w_ref:  (WPK_ROWS, 256) bf16 packed, BN-folded conv weights for layers 1..4.
    p_ref:  (16, 256) f32: rows 0..4 = folded biases, row 5 = final BN scale, row 6 = final BN shift,
            rows 8..15 lanes 0..63 = layer-0 weight (f32, K padded to 8).
    out_ref: (B_pad, FC_SIZE) f32."""
    Bp = out_ref.shape[0]            # padded batch rows per sequence position (multiple of 8)

    def dot(a, b):
        return jnp.dot(a, b, preferred_element_type=jnp.float32)

    # ---- layer 0: one small K=8 f32 MXU dot (weight lives in the f32 param block) ----
    z = dot(x0_ref[...], p_ref[8:16, 0:64])                       # (17*Bp, 64) f32
    x = jnp.maximum(z + p_ref[0:1, 0:64], 0.0)

    # ---- layers 1..4: batch folded into M, BN of the previous layer folded into W/bias ----
    for i in range(1, len(WIDTHS)):
        cin, cout, stride = CIN[i], COUT[i], STRIDES[i]
        l_in = LENS[i]
        span = l_in - 2                                           # stride-1 valid-conv length
        l_out = LENS[i + 1]
        w_off = W_OFFS[i - 1]

        xb = x.astype(jnp.bfloat16)                               # cast once, before slicing

        if cin < 128:
            # three lane-aligned K=64 tap matmuls (avoids an unaligned 192-lane concat)
            z = dot(xb[0:span * Bp], w_ref[w_off:w_off + cin, 0:cout])
            for k in (1, 2):
                z = z + dot(xb[k * Bp:(k + span) * Bp],
                            w_ref[w_off + k * cin:w_off + (k + 1) * cin, 0:cout])
        else:
            # Cin=128: lane concat is 128-aligned -> single im2col matmul
            cols = jnp.concatenate([xb[k * Bp:(k + span) * Bp] for k in range(3)], axis=1)
            z = dot(cols, w_ref[w_off:w_off + 3 * cin, 0:cout])

        if i < len(WIDTHS) - 1:
            y = jnp.maximum(z + p_ref[i:i + 1, 0:cout], 0.0)      # bias + ReLU (BN folded forward)
        else:
            # last layer keeps its own eval-mode BN scale/shift
            y = (jnp.maximum(z + p_ref[i:i + 1, 0:cout], 0.0)
                 * p_ref[5:6, 0:cout] + p_ref[6:7, 0:cout])

        if stride > 1:
            # strided output selection = whole Bp-row (8-aligned) sublane tile copies
            y = jnp.concatenate(
                [y[(stride * t) * Bp:(stride * t + 1) * Bp] for t in range(l_out)], axis=0)
        x = y

    # single output position -> rows are already in batch order
    out_ref[...] = x                                              # one dense (B_pad, 256) store
    # TODO(synk): nn.Dropout(0.2) is identity in eval mode; training-mode RNG dropout not emulated.


def _fold_params(params):
    """Fold each layer's eval-mode BN (scale/shift) into the NEXT layer's weight/bias."""
    Ws = [p[0] for p in params]                 # (3, Cin, Cout) f32
    bs = [p[1][0] for p in params]
    ss = [p[1][1] for p in params]
    sh = [p[1][2] for p in params]
    Wf, bf = [Ws[0]], [bs[0]]
    for i in range(1, len(WIDTHS)):
        Wf.append(Ws[i] * ss[i - 1][None, :, None])
        bf.append(bs[i] + jnp.sum(Ws[i] * sh[i - 1][None, :, None], axis=(0, 1)))
    return Wf, bf, ss[-1], sh[-1]


def cnn_encoder_forward(coords, params):
    B = coords.shape[0]
    B_pad = max(8, ((B + 7) // 8) * 8)          # pad folded batch to full sublane tiles

    # coordinate deltas + layer-0 im2col in plain XLA (rows t-major, batch inner)
    d = coords[:, 1:, :] - coords[:, :-1, :]                        # (B, 19, 2)
    if B_pad != B:
        d = jnp.concatenate(
            [d, jnp.zeros((B_pad - B, INPUT_SIZE, INPUT_DIM), d.dtype)], axis=0)
    dT = jnp.transpose(d, (1, 0, 2))                                # (19, B_pad, 2)
    L0 = LENS[1]
    x0 = jnp.concatenate([dT[k:k + L0] for k in range(3)], axis=-1)  # (17, B_pad, 6)
    x0 = x0.reshape(L0 * B_pad, 3 * INPUT_DIM)
    x0 = jnp.pad(x0, ((0, 0), (0, 2)))                              # K padded 6 -> 8, f32

    # BN folding + weight packing (trace-time constant folding when params are constants)
    Wf, bf, s_last, t_last = _fold_params(params)
    wpk = jnp.zeros((WPK_ROWS, COUT[-1]), jnp.float32)
    for i in range(1, len(WIDTHS)):
        wpk = wpk.at[W_OFFS[i - 1]:W_OFFS[i - 1] + 3 * CIN[i], 0:COUT[i]].set(
            Wf[i].reshape(3 * CIN[i], COUT[i]))
    wpk = wpk.astype(jnp.bfloat16)

    pblk = jnp.zeros((P_ROWS, COUT[-1]), jnp.float32)
    for i in range(len(WIDTHS)):
        pblk = pblk.at[i, 0:COUT[i]].set(bf[i])
    pblk = pblk.at[5, :].set(s_last)
    pblk = pblk.at[6, :].set(t_last)
    pblk = pblk.at[8:8 + 3 * CIN[0], 0:COUT[0]].set(Wf[0].reshape(3 * CIN[0], COUT[0]))

    vmem = pl.BlockSpec(memory_space=pltpu.MemorySpace.VMEM)
    out = pl.pallas_call(
        cnn_encoder_kernel,
        out_shape=jax.ShapeDtypeStruct((B_pad, FC_SIZE), jnp.float32),
        in_specs=[vmem, vmem, vmem],
        out_specs=vmem,
        compiler_params=pltpu.CompilerParams(vmem_limit_bytes=32 * 1024 * 1024),
        cost_estimate=pl.CostEstimate(flops=14_000_000, transcendentals=0,
                                      bytes_accessed=700_000),
    )(x0, wpk, pblk)
    return out[:B]


# ----- deterministic parameter init (synthetic, no checkpoint) -----
def init_params(key):
    params = []
    for i in range(len(WIDTHS)):
        key, kw, kb, kg, kbeta, km, kv = jax.random.split(key, 7)
        fan_in = 3 * CIN[i]
        W = jax.random.normal(kw, (3, CIN[i], COUT[i]), jnp.float32) / math.sqrt(fan_in)
        b = 0.05 * jax.random.normal(kb, (COUT[i],), jnp.float32)
        gamma = 1.0 + 0.1 * jax.random.normal(kg, (COUT[i],), jnp.float32)
        beta = 0.05 * jax.random.normal(kbeta, (COUT[i],), jnp.float32)
        r_mean = 0.05 * jax.random.normal(km, (COUT[i],), jnp.float32)
        r_var = jax.random.uniform(kv, (COUT[i],), jnp.float32, 0.5, 1.5)
        scale = gamma / jnp.sqrt(r_var + BN_EPS)         # eval-mode BN folded to scale/shift
        shift = beta - r_mean * scale
        P = jnp.stack([b, scale, shift], axis=0)         # (3, Cout)
        params.append((W, P))
    return params


# ----- pure-JAX reference (independent conv lowering, no BN folding) -----
def reference_forward(coords, params):
    x = coords[:, 1:, :] - coords[:, :-1, :]             # (B, 19, 2) channels-last
    for (W, P), stride in zip(params, STRIDES):
        x = lax.conv_general_dilated(
            x, W, window_strides=(stride,), padding="VALID",
            dimension_numbers=("NWC", "WIO", "NWC"),
            precision=lax.Precision.HIGHEST)
        x = jnp.maximum(x + P[0][None, None, :], 0.0) * P[1][None, None, :] + P[2][None, None, :]
    return x.reshape(x.shape[0], -1)


if __name__ == "__main__":
    key = jax.random.PRNGKey(0)
    key, kc = jax.random.split(key)
    B = 4
    # batch['coords'] analogue: (B, INPUT_SIZE + 1, INPUT_DIM)
    coords = jax.random.normal(kc, (B, INPUT_SIZE + 1, INPUT_DIM), jnp.float32)
    params = init_params(key)

    out = cnn_encoder_forward(coords, params)
    out = jax.block_until_ready(out)

    ref = reference_forward(coords, params)
    assert out.shape == (B, FC_SIZE)
    if not bool(jnp.allclose(out, ref, rtol=2e-2, atol=2e-2)):
        max_err = float(jnp.max(jnp.abs(out - ref)))
        raise RuntimeError(f"Pallas output mismatch vs reference (max abs err {max_err})")

    print("KERNEL_OK")
</pallas_src>

<mosaic_0001>
module attributes {stable_mosaic.version = 11 : i64} {
  func.func @cnn_encoder_kernel(%arg0: memref<136x8xf32, #tpu.memory_space<vmem>>, %arg1: memref<1152x256xbf16, #tpu.memory_space<vmem>>, %arg2: memref<16x256xf32, #tpu.memory_space<vmem>>, %arg3: memref<8x256xf32, #tpu.memory_space<vmem>>) attributes {dimension_semantics = [], scalar_prefetch = 0 : i64, scratch_operands = 0 : i64, tpu.core_type = #tpu.core_type<tc>} {
    %c0 = arith.constant 0 : index
    %c0_0 = arith.constant 0 : index
    %0 = vector.load %arg0[%c0, %c0_0] : memref<136x8xf32, #tpu.memory_space<vmem>>, vector<136x8xf32>
    %c8 = arith.constant 8 : index
    %c0_1 = arith.constant 0 : index
    %1 = vector.load %arg2[%c8, %c0_1] : memref<16x256xf32, #tpu.memory_space<vmem>>, vector<8x64xf32>
    %cst = arith.constant dense<0.000000e+00> : vector<136x64xf32>
    %2 = tpu.matmul %0, %1, %cst {dimension_numbers = #tpu.dot_dimension_numbers<[1], [0], [0], [1], [0, 0, 1, 1], [], []>} : vector<136x8xf32>, vector<8x64xf32>, vector<136x64xf32> -> vector<136x64xf32>
    %c0_2 = arith.constant 0 : index
    %c0_3 = arith.constant 0 : index
    %3 = vector.load %arg2[%c0_2, %c0_3] : memref<16x256xf32, #tpu.memory_space<vmem>>, vector<1x64xf32>
    %4 = vector.broadcast %3 : vector<1x64xf32> to vector<136x64xf32>
    %5 = arith.addf %2, %4 : vector<136x64xf32>
    %cst_4 = arith.constant 0.000000e+00 : f32
    %6 = vector.broadcast %cst_4 : f32 to vector<136x64xf32>
    %7 = arith.maximumf %5, %6 : vector<136x64xf32>
    %8 = arith.truncf %7 : vector<136x64xf32> to vector<136x64xbf16>
    %9 = vector.extract_strided_slice %8 {offsets = [0, 0], sizes = [120, 64], strides = [1, 1]} : vector<136x64xbf16> to vector<120x64xbf16>
    %c0_5 = arith.constant 0 : index
    %c0_6 = arith.constant 0 : index
    %10 = vector.load %arg1[%c0_5, %c0_6] : memref<1152x256xbf16, #tpu.memory_space<vmem>>, vector<64x64xbf16>
    %cst_7 = arith.constant dense<0.000000e+00> : vector<120x64xf32>
    %11 = tpu.matmul %9, %10, %cst_7 {dimension_numbers = #tpu.dot_dimension_numbers<[1], [0], [0], [1], [0, 0, 1, 1], [], []>} : vector<120x64xbf16>, vector<64x64xbf16>, vector<120x64xf32> -> vector<120x64xf32>
    %12 = vector.extract_strided_slice %8 {offsets = [8, 0], sizes = [120, 64], strides = [1, 1]} : vector<136x64xbf16> to vector<120x64xbf16>
    %c64 = arith.constant 64 : index
    %c0_8 = arith.constant 0 : index
    %13 = vector.load %arg1[%c64, %c0_8] : memref<1152x256xbf16, #tpu.memory_space<vmem>>, vector<64x64xbf16>
    %cst_9 = arith.constant dense<0.000000e+00> : vector<120x64xf32>
    %14 = tpu.matmul %12, %13, %cst_9 {dimension_numbers = #tpu.dot_dimension_numbers<[1], [0], [0], [1], [0, 0, 1, 1], [], []>} : vector<120x64xbf16>, vector<64x64xbf16>, vector<120x64xf32> -> vector<120x64xf32>
    %15 = arith.addf %11, %14 : vector<120x64xf32>
    %16 = vector.extract_strided_slice %8 {offsets = [16, 0], sizes = [120, 64], strides = [1, 1]} : vector<136x64xbf16> to vector<120x64xbf16>
    %c128 = arith.constant 128 : index
    %c0_10 = arith.constant 0 : index
    %17 = vector.load %arg1[%c128, %c0_10] : memref<1152x256xbf16, #tpu.memory_space<vmem>>, vector<64x64xbf16>
    %cst_11 = arith.constant dense<0.000000e+00> : vector<120x64xf32>
    %18 = tpu.matmul %16, %17, %cst_11 {dimension_numbers = #tpu.dot_dimension_numbers<[1], [0], [0], [1], [0, 0, 1, 1], [], []>} : vector<120x64xbf16>, vector<64x64xbf16>, vector<120x64xf32> -> vector<120x64xf32>
    %19 = arith.addf %15, %18 : vector<120x64xf32>
    %c1 = arith.constant 1 : index
    %c0_12 = arith.constant 0 : index
    %20 = vector.load %arg2[%c1, %c0_12] : memref<16x256xf32, #tpu.memory_space<vmem>>, vector<1x64xf32>
    %21 = vector.broadcast %20 : vector<1x64xf32> to vector<120x64xf32>
    %22 = arith.addf %19, %21 : vector<120x64xf32>
    %cst_13 = arith.constant 0.000000e+00 : f32
    %23 = vector.broadcast %cst_13 : f32 to vector<120x64xf32>
    %24 = arith.maximumf %22, %23 : vector<120x64xf32>
    %25 = arith.truncf %24 : vector<120x64xf32> to vector<120x64xbf16>
    %26 = vector.extract_strided_slice %25 {offsets = [0, 0], sizes = [104, 64], strides = [1, 1]} : vector<120x64xbf16> to vector<104x64xbf16>
    %c192 = arith.constant 192 : index
    %c0_14 = arith.constant 0 : index
    %27 = vector.load %arg1[%c192, %c0_14] : memref<1152x256xbf16, #tpu.memory_space<vmem>>, vector<64x128xbf16>
    %cst_15 = arith.constant dense<0.000000e+00> : vector<104x128xf32>
    %28 = tpu.matmul %26, %27, %cst_15 {dimension_numbers = #tpu.dot_dimension_numbers<[1], [0], [0], [1], [0, 0, 1, 1], [], []>} : vector<104x64xbf16>, vector<64x128xbf16>, vector<104x128xf32> -> vector<104x128xf32>
    %29 = vector.extract_strided_slice %25 {offsets = [8, 0], sizes = [104, 64], strides = [1, 1]} : vector<120x64xbf16> to vector<104x64xbf16>
    %c256 = arith.constant 256 : index
    %c0_16 = arith.constant 0 : index
    %30 = vector.load %arg1[%c256, %c0_16] : memref<1152x256xbf16, #tpu.memory_space<vmem>>, vector<64x128xbf16>
    %cst_17 = arith.constant dense<0.000000e+00> : vector<104x128xf32>
    %31 = tpu.matmul %29, %30, %cst_17 {dimension_numbers = #tpu.dot_dimension_numbers<[1], [0], [0], [1], [0, 0, 1, 1], [], []>} : vector<104x64xbf16>, vector<64x128xbf16>, vector<104x128xf32> -> vector<104x128xf32>
    %32 = arith.addf %28, %31 : vector<104x128xf32>
    %33 = vector.extract_strided_slice %25 {offsets = [16, 0], sizes = [104, 64], strides = [1, 1]} : vector<120x64xbf16> to vector<104x64xbf16>
    %c320 = arith.constant 320 : index
    %c0_18 = arith.constant 0 : index
    %34 = vector.load %arg1[%c320, %c0_18] : memref<1152x256xbf16, #tpu.memory_space<vmem>>, vector<64x128xbf16>
    %cst_19 = arith.constant dense<0.000000e+00> : vector<104x128xf32>
    %35 = tpu.matmul %33, %34, %cst_19 {dimension_numbers = #tpu.dot_dimension_numbers<[1], [0], [0], [1], [0, 0, 1, 1], [], []>} : vector<104x64xbf16>, vector<64x128xbf16>, vector<104x128xf32> -> vector<104x128xf32>
    %36 = arith.addf %32, %35 : vector<104x128xf32>
    %c2 = arith.constant 2 : index
    %c0_20 = arith.constant 0 : index
    %37 = vector.load %arg2[%c2, %c0_20] : memref<16x256xf32, #tpu.memory_space<vmem>>, vector<1x128xf32>
    %38 = vector.broadcast %37 : vector<1x128xf32> to vector<104x128xf32>
    %39 = arith.addf %36, %38 : vector<104x128xf32>
    %cst_21 = arith.constant 0.000000e+00 : f32
    %40 = vector.broadcast %cst_21 : f32 to vector<104x128xf32>
    %41 = arith.maximumf %39, %40 : vector<104x128xf32>
    %42 = vector.extract_strided_slice %41 {offsets = [0, 0], sizes = [8, 128], strides = [1, 1]} : vector<104x128xf32> to vector<8x128xf32>
    %43 = vector.extract_strided_slice %41 {offsets = [16, 0], sizes = [8, 128], strides = [1, 1]} : vector<104x128xf32> to vector<8x128xf32>
    %44 = vector.extract_strided_slice %41 {offsets = [32, 0], sizes = [8, 128], strides = [1, 1]} : vector<104x128xf32> to vector<8x128xf32>
    %45 = vector.extract_strided_slice %41 {offsets = [48, 0], sizes = [8, 128], strides = [1, 1]} : vector<104x128xf32> to vector<8x128xf32>
    %46 = vector.extract_strided_slice %41 {offsets = [64, 0], sizes = [8, 128], strides = [1, 1]} : vector<104x128xf32> to vector<8x128xf32>
    %47 = vector.extract_strided_slice %41 {offsets = [80, 0], sizes = [8, 128], strides = [1, 1]} : vector<104x128xf32> to vector<8x128xf32>
    %48 = vector.extract_strided_slice %41 {offsets = [96, 0], sizes = [8, 128], strides = [1, 1]} : vector<104x128xf32> to vector<8x128xf32>
    %49 = tpu.concatenate %42, %43, %44, %45, %46, %47, %48 in 0 : vector<8x128xf32>, vector<8x128xf32>, vector<8x128xf32>, vector<8x128xf32>, vector<8x128xf32>, vector<8x128xf32>, vector<8x128xf32> -> vector<56x128xf32>
    %50 = arith.truncf %49 : vector<56x128xf32> to vector<56x128xbf16>
    %51 = vector.extract_strided_slice %50 {offsets = [0, 0], sizes = [40, 128], strides = [1, 1]} : vector<56x128xbf16> to vector<40x128xbf16>
    %52 = vector.extract_strided_slice %50 {offsets = [8, 0], sizes = [40, 128], strides = [1, 1]} : vector<56x128xbf16> to vector<40x128xbf16>
    %53 = vector.extract_strided_slice %50 {offsets = [16, 0], sizes = [40, 128], strides = [1, 1]} : vector<56x128xbf16> to vector<40x128xbf16>
    %54 = tpu.concatenate %51, %52, %53 in 1 : vector<40x128xbf16>, vector<40x128xbf16>, vector<40x128xbf16> -> vector<40x384xbf16>
    %c384 = arith.constant 384 : index
    %c0_22 = arith.constant 0 : index
    %55 = vector.load %arg1[%c384, %c0_22] : memref<1152x256xbf16, #tpu.memory_space<vmem>>, vector<384x128xbf16>
    %cst_23 = arith.constant dense<0.000000e+00> : vector<40x128xf32>
    %56 = tpu.matmul %54, %55, %cst_23 {dimension_numbers = #tpu.dot_dimension_numbers<[1], [0], [0], [1], [0, 0, 1, 1], [], []>} : vector<40x384xbf16>, vector<384x128xbf16>, vector<40x128xf32> -> vector<40x128xf32>
    %c3 = arith.constant 3 : index
    %c0_24 = arith.constant 0 : index
    %57 = vector.load %arg2[%c3, %c0_24] : memref<16x256xf32, #tpu.memory_space<vmem>>, vector<1x128xf32>
    %58 = vector.broadcast %57 : vector<1x128xf32> to vector<40x128xf32>
    %59 = arith.addf %56, %58 : vector<40x128xf32>
    %cst_25 = arith.constant 0.000000e+00 : f32
    %60 = vector.broadcast %cst_25 : f32 to vector<40x128xf32>
    %61 = arith.maximumf %59, %60 : vector<40x128xf32>
    %62 = vector.extract_strided_slice %61 {offsets = [0, 0], sizes = [8, 128], strides = [1, 1]} : vector<40x128xf32> to vector<8x128xf32>
    %63 = vector.extract_strided_slice %61 {offsets = [16, 0], sizes = [8, 128], strides = [1, 1]} : vector<40x128xf32> to vector<8x128xf32>
    %64 = vector.extract_strided_slice %61 {offsets = [32, 0], sizes = [8, 128], strides = [1, 1]} : vector<40x128xf32> to vector<8x128xf32>
    %65 = tpu.concatenate %62, %63, %64 in 0 : vector<8x128xf32>, vector<8x128xf32>, vector<8x128xf32> -> vector<24x128xf32>
    %66 = arith.truncf %65 : vector<24x128xf32> to vector<24x128xbf16>
    %67 = vector.extract_strided_slice %66 {offsets = [0, 0], sizes = [8, 128], strides = [1, 1]} : vector<24x128xbf16> to vector<8x128xbf16>
    %68 = vector.extract_strided_slice %66 {offsets = [8, 0], sizes = [8, 128], strides = [1, 1]} : vector<24x128xbf16> to vector<8x128xbf16>
    %69 = vector.extract_strided_slice %66 {offsets = [16, 0], sizes = [8, 128], strides = [1, 1]} : vector<24x128xbf16> to vector<8x128xbf16>
    %70 = tpu.concatenate %67, %68, %69 in 1 : vector<8x128xbf16>, vector<8x128xbf16>, vector<8x128xbf16> -> vector<8x384xbf16>
    %c768 = arith.constant 768 : index
    %c0_26 = arith.constant 0 : index
    %71 = vector.load %arg1[%c768, %c0_26] : memref<1152x256xbf16, #tpu.memory_space<vmem>>, vector<384x256xbf16>
    %cst_27 = arith.constant dense<0.000000e+00> : vector<8x256xf32>
    %72 = tpu.matmul %70, %71, %cst_27 {dimension_numbers = #tpu.dot_dimension_numbers<[1], [0], [0], [1], [0, 0, 1, 1], [], []>} : vector<8x384xbf16>, vector<384x256xbf16>, vector<8x256xf32> -> vector<8x256xf32>
    %c4 = arith.constant 4 : index
    %c0_28 = arith.constant 0 : index
    %73 = vector.load %arg2[%c4, %c0_28] : memref<16x256xf32, #tpu.memory_space<vmem>>, vector<1x256xf32>
    %74 = vector.broadcast %73 : vector<1x256xf32> to vector<8x256xf32>
    %75 = arith.addf %72, %74 : vector<8x256xf32>
    %cst_29 = arith.constant 0.000000e+00 : f32
    %76 = vector.broadcast %cst_29 : f32 to vector<8x256xf32>
    %77 = arith.maximumf %75, %76 : vector<8x256xf32>
    %c5 = arith.constant 5 : index
    %c0_30 = arith.constant 0 : index
    %78 = vector.load %arg2[%c5, %c0_30] : memref<16x256xf32, #tpu.memory_space<vmem>>, vector<1x256xf32>
    %79 = vector.broadcast %78 : vector<1x256xf32> to vector<8x256xf32>
    %80 = arith.mulf %77, %79 : vector<8x256xf32>
    %c6 = arith.constant 6 : index
    %c0_31 = arith.constant 0 : index
    %81 = vector.load %arg2[%c6, %c0_31] : memref<16x256xf32, #tpu.memory_space<vmem>>, vector<1x256xf32>
    %82 = vector.broadcast %81 : vector<1x256xf32> to vector<8x256xf32>
    %83 = arith.addf %80, %82 : vector<8x256xf32>
    %c0_32 = arith.constant 0 : index
    %c0_33 = arith.constant 0 : index
    %84 = vector.load %arg3[%c0_32, %c0_33] : memref<8x256xf32, #tpu.memory_space<vmem>>, vector<8x256xf32>
    tpu.vector_store %arg3[%c0_32, %c0_33], %83 {strides = array<i32>} : memref<8x256xf32, #tpu.memory_space<vmem>>, vector<8x256xf32>,
    return
  }
}

</mosaic_0001>

<bundles_post_ra>
// kernel: tpu_custom_call.1
= control target key start
LH: loop header
LB: loop body
LE: loop exit
PB: predicated region body
PF: predicated region fallthrough
CT: control target
= control target key end

     0   :  { %8 = vsyncpa [#allocation3], 0  ;;  %s3155_s0 = inlined_call_operand.vmem [shape: f32[136,8], index: 0, kind: input, shape index: {}]   ;;  %s3156_s1 = inlined_call_operand.hbm [shape: bf16[1152,256], index: 1, kind: input, shape index: {}]   ;;  %s3157_s2 = inlined_call_operand.vmem [shape: f32[16,256], index: 2, kind: input, shape index: {}]   ;;  %s3158_s3 = inlined_call_operand.hbm [shape: f32[8,256], index: 3, kind: output, shape index: {}]  }
   0x1   :  { %9 = vsyncpa [#allocation4], 0  ;;  %s2737_s12 = smov [#allocation2]   ;;  %s2689_s16 = scalar_lea.hbm %s3156_s1, 18432 }
   0x2   :  { %s17_s13 = sshll.u32 %s2737_s12, 4  ;;  %p2690_p0 = scmp.ne.s32.totalorder %s3156_s1, %s2689_s16  ;;  %s18_s13 = int_to_ptr.vmem [resolvable:$true] %s17_s13 }
   0x3   :  { %p2693_p1 = scmp.lt.u32.totalorder %s2689_s16, %s3156_s1 }
   0x5   :  { %p2695_p2 = pnand %p2693_p1, %p2690_p0 }
   0x7   :  { %2698 = shalt.err (!%p2695_p2)
}
   0x8   :  { %s2699_s21 = scalar_lea.vmem %s18_s13, 18432  ;;  %p2704_p4 = scmp.lt.s32.totalorder %s18_s13, %s18_s13 }
   0x9   :  { %p2700_p3 = scmp.ne.s32.totalorder %s18_s13, %s2699_s21  ;;  %p2705_p5 = scmp.lt.s32.totalorder %s2699_s21, %s2699_s21 }
   0xb   :  { %p2706_p6 = por %p2705_p5, %p2704_p4 }
   0xd   :  { %p2707_p7 = pnand %p2706_p6, %p2700_p3 }
   0xf   :  { %2710 = shalt.err (!%p2707_p7)
}
  0x10   :  { %s2738_s22 = smov 128   ;;  %s2739_s23 = smov 8  }
  0x11   :  { %23 = dma.hbm_to_vmem [thread:$0]  %s3156_s1, 18432, %s18_s13, [#allocation3], %s2738_s22, %s2738_s22, %s2739_s23  }
  0x12   :  { %2733 = dma.done.wait [#allocation3], 18432  }
  0x13   :  { %2734 = vsyncadd [#allocation3], 4294948864  ;;  %v2740_v0 = vmov 0.0   ;;  %vm2741_vm0 = vmmov 0   ;;  %vm49_vm1 = vcmask 64512   ;;  %v47_v1 = vld [vmem:[%s3157_s2 + $0x10] sm:$0xff] }
  0x14   :  { %2269 = vmatprep.subr.mxu0 %v2740_v0  ;;  %2271 = vmatprep.mubr.msk.f32.mxu0 %vm2741_vm0, %v2740_v0  ;;  %v30_v2 = vld [vmem:[%s3155_s0] sm:$0xff]  ;;  %v31_v3 = vld [vmem:[%s3155_s0 + $0x8] sm:$0xff]  ;;  %v32_v5 = vld [vmem:[%s3155_s0 + $0x10] sm:$0xff]  ;;  %vm301_vm2 = vcmask 1043456   ;;  %vm341_vm3 = vcmask 523264   ;;  %s2743_s19 = smov [#allocation5]  }
  0x15   :  { %2530 = vmatprep.subr.mxu1 %v2740_v0  ;;  %2310 = vmatprep.mubr.msk.f32.mxu1 %vm2741_vm0, %v2740_v0  ;;  %v43_v4 = vld [vmem:[%s3155_s0 + $0x68] sm:$0xff]  ;;  %v44_v6 = vld [vmem:[%s3155_s0 + $0x70] sm:$0xff]  ;;  %v45_v7 = vld [vmem:[%s3155_s0 + $0x78] sm:$0xff]  ;;  %s1967_s20 = sshll.u32 %s2743_s19, 4  ;;  %s1968_s20 = int_to_ptr.vmem [resolvable:$true] %s1967_s20 }
  0x16   :  { %2270 = vmatpush3.msra.mxu0 %v47_v1  ;;  %2531 = vmatpush3.msra.mxu1 %v47_v1  ;;  %v33_v8 = vld [vmem:[%s3155_s0 + $0x18] sm:$0xff]  ;;  %v46_v9 = vld [vmem:[%s3155_s0 + $0x80] sm:$0xff]  ;;  %v35_v11 = vld [vmem:[%s3155_s0 + $0x28] sm:$0xff]  ;;  %p2716_p9 = scmp.lt.s32.totalorder %s1968_s20, %s1968_s20 }
  0x17   :  { %2272 = vmatmul.mubr.msk.f32.vlgmr.msra.gmra.mrb[0].mxu0 %vm49_vm1, %v30_v2  ;;  %2394 = vmatprep.subr.bf16.mxu0 %v2740_v0  ;;  %v34_v10 = vld [vmem:[%s3155_s0 + $0x20] sm:$0xff]  ;;  %v36_v12 = vld [vmem:[%s3155_s0 + $0x30] sm:$0xff]  ;;  %v37_v13 = vld [vmem:[%s3155_s0 + $0x38] sm:$0xff] }
  0x18   :  { %2274 = vmatprep.mubr.msk.f32.mxu0 %vm2741_vm0, %v2740_v0  ;;  %2311 = vmatmul.mubr.msk.f32.vlgmr.msra.gmra.mrb[0].mxu1 %vm49_vm1, %v43_v4  ;;  %v38_v14 = vld [vmem:[%s3155_s0 + $0x40] sm:$0xff]  ;;  %v39_v15 = vld [vmem:[%s3155_s0 + $0x48] sm:$0xff]  ;;  %v40_v16 = vld [vmem:[%s3155_s0 + $0x50] sm:$0xff] }
  0x19   :  { %2313 = vmatprep.mubr.msk.f32.mxu1 %vm2741_vm0, %v2740_v0  ;;  %v41_v17 = vld [vmem:[%s3155_s0 + $0x58] sm:$0xff]  ;;  %v42_v18 = vld [vmem:[%s3155_s0 + $0x60] sm:$0xff]  ;;  %v2569_v19 = vld [vmem:[#allocation2 + $0x40] ss:$8 sps:$4 sm:$0xff]  }
  0x1a   :  { %2322 = vmatprep.subr.bf16.mxu1 %v2569_v19  ;;  %v2570_v20 = vld [vmem:[#allocation2 + $0x50] ss:$8 sps:$4 sm:$0xff]   ;;  %v2571_v21 = vld [vmem:[#allocation2 + $0x60] ss:$8 sps:$4 sm:$0xff]  }
  0x1b   :  { %2275 = vmatmul.mubr.msk.f32.gmra.mrb[2].mxu0 %vm49_vm1, %v31_v3  ;;  %2323 = vmatpush3.bf16.msra.mxu1 %v2569_v19  ;;  %v2572_v22 = vld [vmem:[#allocation2 + $0x70] ss:$8 sps:$4 sm:$0xff]   ;;  %v2573_v23 = vld [vmem:[#allocation2] ss:$8 sps:$4 sm:$0xff]  }
  0x1c   :  { %2277 = vmatprep.mubr.msk.f32.mxu0 %vm2741_vm0, %v2740_v0  ;;  %2314 = vmatmul.mubr.msk.f32.gmra.mrb[2].mxu1 %vm49_vm1, %v44_v6  ;;  %v2889_v24 = vld [vmem:[%s3157_s2] ss:$0 sm:$0xff] }
  0x1d   :  { %2316 = vmatprep.mubr.msk.f32.mxu1 %vm2741_vm0, %v2740_v0  ;;  %2324 = vmatprep.subr.bf16.mxu1 %v2570_v20 }
  0x1f   :  { %2278 = vmatmul.mubr.msk.f32.gmra.mrb[4].mxu0 %vm49_vm1, %v32_v5  ;;  %2325 = vmatpush3.bf16.msra.mxu1 %v2570_v20 }
  0x20   :  { %2280 = vmatprep.mubr.msk.f32.mxu0 %vm2741_vm0, %v2740_v0  ;;  %2317 = vmatmul.mubr.msk.f32.gmra.mrb[4].mxu1 %vm49_vm1, %v45_v7 }
  0x21   :  { %2319 = vmatprep.mubr.msk.f32.mxu1 %vm2741_vm0, %v2740_v0  ;;  %2326 = vmatprep.subr.bf16.mxu1 %v2571_v21 }
  0x23   :  { %2281 = vmatmul.mubr.msk.f32.gmra.mrb[6].mxu0 %vm49_vm1, %v33_v8  ;;  %2327 = vmatpush3.bf16.msra.mxu1 %v2571_v21 }
  0x24   :  { %2283 = vmatprep.mubr.msk.f32.mxu0 %vm2741_vm0, %v2740_v0  ;;  %2320 = vmatmul.mubr.msk.f32.gmra.mrb[6].mxu1 %vm49_vm1, %v46_v9 }
  0x25   :  { %2328 = vmatprep.subr.bf16.mxu1 %v2572_v22 }
  0x27   :  { %2284 = vmatmul.mubr.msk.f32.gmra.mrb[8].mxu0 %vm49_vm1, %v34_v10  ;;  %2329 = vmatpush3.bf16.msra.mxu1 %v2572_v22 }
  0x28   :  { %2286 = vmatprep.mubr.msk.f32.mxu0 %vm2741_vm0, %v2740_v0  ;;  %2346 = vmatprep.subr.bf16.mxu1 %v2573_v23 }
  0x2b   :  { %2287 = vmatmul.mubr.msk.f32.gmra.mrb[10].mxu0 %vm49_vm1, %v35_v11  ;;  %v2574_v11 = vld [vmem:[#allocation2 + $0x10] ss:$8 sps:$4 sm:$0xff]  }
  0x2c   :  { %2289 = vmatprep.mubr.msk.f32.mxu0 %vm2741_vm0, %v2740_v0 }
  0x2f   :  { %2290 = vmatmul.mubr.msk.f32.gmra.mrb[12].mxu0 %vm49_vm1, %v36_v12 }
  0x30   :  { %2292 = vmatprep.mubr.msk.f32.mxu0 %vm2741_vm0, %v2740_v0 }
  0x33   :  { %2293 = vmatmul.mubr.msk.f32.gmra.mrb[14].mxu0 %vm49_vm1, %v37_v13 }
  0x34   :  { %2295 = vmatprep.mubr.msk.f32.mxu0 %vm2741_vm0, %v2740_v0 }
  0x37   :  { %2296 = vmatmul.mubr.msk.f32.gmra.mrb[16].mxu0 %vm49_vm1, %v38_v14 }
  0x38   :  { %2298 = vmatprep.mubr.msk.f32.mxu0 %vm2741_vm0, %v2740_v0 }
  0x3b   :  { %2299 = vmatmul.mubr.msk.f32.gmra.mrb[18].mxu0 %vm49_vm1, %v39_v15 }
  0x3c   :  { %2301 = vmatprep.mubr.msk.f32.mxu0 %vm2741_vm0, %v2740_v0 }
  0x3f   :  { %2302 = vmatmul.mubr.msk.f32.gmra.mrb[20].mxu0 %vm49_vm1, %v40_v16 }
  0x40   :  { %2304 = vmatprep.mubr.msk.f32.mxu0 %vm2741_vm0, %v2740_v0 }
  0x43   :  { %2305 = vmatmul.mubr.msk.f32.gmra.mrb[22].mxu0 %vm49_vm1, %v41_v17 }
  0x44   :  { %2307 = vmatprep.mubr.msk.f32.mxu0 %vm2741_vm0, %v2740_v0 }
  0x47   :  { %2308 = vmatmul.mubr.msk.f32.gmra.mrb[24].mxu0 %vm49_vm1, %v42_v18  ;;  %v2575_v18 = vld [vmem:[#allocation2 + $0x20] ss:$8 sps:$4 sm:$0xff]  }
  0x48   :  { %2402 = vmatprep.mubr.msk.bf16.mxu0 %vm2741_vm0, %v2740_v0 }
  0xea   :  { %v167_v25 = vpop.f32.mrb[0].mxu0 }
  0xeb   :  { %v2273_v26 = vpop.f32.mrb[1].mxu0  ;;  %v168_v27 = vadd.f32 %v167_v25, %v2889_v24  ;;  %v2892_v28 = vpop.f32.mrb[0].mxu1 }
  0xec   :  { %v2312_v30 = vpop.f32.mrb[1].mxu1  ;;  %v2576_v26 = vld [vmem:[#allocation2 + $0x30] ss:$8 sps:$4 sm:$0xff]  }
  0xed   :  { %v251_v33 = vmax.f32 %v168_v27, 0.0 }
  0xee   :  { %v172_v29 = vpop.f32.mrb[2].mxu0 }
  0xef   :  { %v173_v31 = vadd.f32 %v172_v29, %v2889_v24  ;;  %v2276_v32 = vpop.f32.mrb[3].mxu0  ;;  %v237_v35 = vpop.f32.mrb[2].mxu1 }
  0xf0   :  { %v238_v37 = vadd.f32 %v237_v35, %v2889_v24  ;;  %v2315_v38 = vpop.f32.mrb[3].mxu1 }
  0xf1   :  { %v252_v34 = vmax.f32 %v173_v31, 0.0 }
  0xf2   :  { %v177_v36 = vpop.f32.mrb[4].mxu0  ;;  %v265_v44 = vmax.f32 %v238_v37, 0.0 }
  0xf3   :  { %v2896_v39 = vpack.c.bf16 %v252_v34, %v251_v33  ;;  %v2279_v40 = vpop.f32.mrb[5].mxu0  ;;  %v178_v41 = vadd.f32 %v177_v36, %v2889_v24  ;;  %v242_v42 = vpop.f32.mrb[4].mxu1  ;;  %v2577_v33 = vld [vmem:[#allocation2 + $0x80] ss:$8 sps:$4 sm:$0xff]  }
  0xf4   :  { %v243_v45 = vadd.f32 %v242_v42, %v2889_v24  ;;  %v2318_v46 = vpop.f32.mrb[5].mxu1 }
  0xf5   :  { %v253_v50 = vmax.f32 %v178_v41, 0.0  ;;  %v302_v59 = vrot.slane %v2896_v39, 4  ;;  %v233_v41 = vadd.f32 %v2892_v28, %v2889_v24 }
  0xf6   :  { %v182_v43 = vpop.f32.mrb[6].mxu0  ;;  %v266_v49 = vmax.f32 %v243_v45, 0.0 }
  0xf7   :  { %v183_v47 = vadd.f32 %v182_v43, %v2889_v24  ;;  %v2282_v48 = vpop.f32.mrb[7].mxu0  ;;  %v247_v52 = vpop.f32.mrb[6].mxu1 }
  0xf8   :  { %v2901_v54 = vpack.c.bf16 %v266_v49, %v265_v44  ;;  %v2904_v55 = vadd.f32 %v247_v52, %v2889_v24  ;;  %v2321_v56 = vpop.f32.mrb[7].mxu1  ;;  %v264_v48 = vmax.f32 %v233_v41, 0.0 }
  0xf9   :  { %v254_v51 = vmax.f32 %v183_v47, 0.0 }
  0xfa   :  { %v187_v53 = vpop.f32.mrb[8].mxu0  ;;  %v315_v56 = vrot.slane %v2901_v54, 4 }
  0xfb   :  { %v2906_v57 = vpack.c.bf16 %v254_v51, %v253_v50  ;;  %v2285_v58 = vpop.f32.mrb[9].mxu0  ;;  %v188_v61 = vadd.f32 %v187_v53, %v2889_v24 }
  0xfd   :  { %v303_v60 = vrot.slane %v2906_v57, 4  ;;  %v255_v3 = vmax.f32 %v188_v61, 0.0  ;;  %v2579_v61 = vld [vmem:[#allocation2 + $0xa0] ss:$8 sps:$4 sm:$0xff]  }
  0xfe   :  { %v192_v62 = vpop.f32.mrb[10].mxu0 }
  0xff   :  { %v193_v63 = vadd.f32 %v192_v62, %v2889_v24  ;;  %v2288_v1 = vpop.f32.mrb[11].mxu0  ;;  %v304_v2 = vsel %vm301_vm2, %v302_v59, %v303_v60  ;;  %v2580_v62 = vld [vmem:[#allocation2 + $0xb0] ss:$8 sps:$4 sm:$0xff]  }
 0x100   :  { %2330 = vmatprep.mubr.msk.bf16.mxu1 %vm341_vm3, %v304_v2  ;;  %v2582_v1 = vld [vmem:[#allocation2 + $0x110] ss:$8 sps:$4 sm:$0xff]   ;;  %v2583_v2 = vld [vmem:[#allocation2 + $0x120] ss:$8 sps:$4 sm:$0xff]  }
 0x101   :  { %v256_v4 = vmax.f32 %v193_v63, 0.0 }
 0x102   :  { %v197_v5 = vpop.f32.mrb[12].mxu0 }
 0x103   :  { %v2914_v6 = vpack.c.bf16 %v256_v4, %v255_v3  ;;  %v2291_v7 = vpop.f32.mrb[13].mxu0  ;;  %v198_v9 = vadd.f32 %v197_v5, %v2889_v24  ;;  %v2587_v3 = vld [vmem:[#allocation2 + $0xe0] ss:$8 sps:$4 sm:$0xff]   ;;  %v2586_v4 = vld [vmem:[#allocation2 + $0x130] ss:$8 sps:$4 sm:$0xff]  }
 0x104   :  { %v2588_v5 = vld [vmem:[#allocation2 + $0xf0] ss:$8 sps:$4 sm:$0xff]  }
 0x105   :  { %v305_v8 = vrot.slane %v2914_v6, 4  ;;  %v257_v15 = vmax.f32 %v198_v9, 0.0 }
 0x106   :  { %v202_v10 = vpop.f32.mrb[14].mxu0 }
 0x107   :  { %v203_v12 = vadd.f32 %v202_v10, %v2889_v24  ;;  %v2294_v13 = vpop.f32.mrb[15].mxu0  ;;  %v306_v14 = vsel %vm301_vm2, %v303_v60, %v305_v8 }
 0x108   :  { %2331 = vmatmul.mubr.msk.bf16.vlgmr.msra.gmra.mrb[8].mxu1 %vm341_vm3, %v306_v14 }
 0x109   :  { %v258_v16 = vmax.f32 %v203_v12, 0.0  ;;  %2347 = vmatpush3.bf16.msra.mxu1 %v2573_v23 }
 0x10a   :  { %v207_v17 = vpop.f32.mrb[16].mxu0  ;;  %2348 = vmatprep.subr.bf16.mxu1 %v2574_v11 }
 0x10b   :  { %v2921_v19 = vpack.c.bf16 %v258_v16, %v257_v15  ;;  %v2297_v20 = vpop.f32.mrb[17].mxu0  ;;  %v208_v22 = vadd.f32 %v207_v17, %v2889_v24  ;;  %v2988_v17 = vld [vmem:[%s3157_s2 + $0x1] ss:$0 sm:$0xff] }
 0x10d   :  { %v307_v21 = vrot.slane %v2921_v19, 4  ;;  %2349 = vmatpush3.bf16.msra.mxu1 %v2574_v11  ;;  %v259_v23 = vmax.f32 %v208_v22, 0.0 }
 0x10e   :  { %v212_v25 = vpop.f32.mrb[18].mxu0  ;;  %2350 = vmatprep.subr.bf16.mxu1 %v2575_v18 }
 0x10f   :  { %v213_v27 = vadd.f32 %v212_v25, %v2889_v24  ;;  %v2300_v29 = vpop.f32.mrb[19].mxu0  ;;  %v308_v30 = vsel %vm301_vm2, %v305_v8, %v307_v21 }
 0x110   :  { %2334 = vmatprep.mubr.msk.bf16.mxu1 %vm341_vm3, %v308_v30 }
 0x111   :  { %v260_v31 = vmax.f32 %v213_v27, 0.0  ;;  %2351 = vmatpush3.bf16.msra.mxu1 %v2575_v18 }
 0x112   :  { %v217_v32 = vpop.f32.mrb[20].mxu0  ;;  %2352 = vmatprep.subr.bf16.mxu1 %v2576_v26 }
 0x113   :  { %v272_v34 = vpack.c.bf16 %v260_v31, %v259_v23  ;;  %v2303_v35 = vpop.f32.mrb[21].mxu0  ;;  %v218_v37 = vadd.f32 %v217_v32, %v2889_v24 }
 0x115   :  { %v309_v36 = vrot.slane %v272_v34, 4  ;;  %2353 = vmatpush3.bf16.msra.mxu1 %v2576_v26  ;;  %v261_v44 = vmax.f32 %v218_v37, 0.0 }
 0x116   :  { %v222_v38 = vpop.f32.mrb[22].mxu0  ;;  %2370 = vmatprep.subr.bf16.mxu1 %v2577_v33 }
 0x117   :  { %v223_v40 = vadd.f32 %v222_v38, %v2889_v24  ;;  %v2306_v42 = vpop.f32.mrb[23].mxu0  ;;  %v310_v43 = vsel %vm301_vm2, %v307_v21, %v309_v36 }
 0x118   :  { %2335 = vmatmul.mubr.msk.bf16.gmra.mrb[12].mxu1 %vm341_vm3, %v310_v43  ;;  %v2589_v42 = vld [vmem:[#allocation2 + $0x140] ss:$8 sps:$4 sm:$0xff]  }
 0x119   :  { %v262_v45 = vmax.f32 %v223_v40, 0.0 }
 0x11a   :  { %v227_v46 = vpop.f32.mrb[24].mxu0 }
 0x11b   :  { %v273_v47 = vpack.c.bf16 %v262_v45, %v261_v44  ;;  %v228_v49 = vadd.f32 %v227_v46, %v2889_v24  ;;  %v2309_v50 = vpop.f32.mrb[25].mxu0  ;;  %v2578_v24 = vld [vmem:[#allocation2 + $0x90] ss:$8 sps:$4 sm:$0xff]  }
 0x11d   :  { %v311_v51 = vrot.slane %v273_v47, 4  ;;  %v263_v52 = vmax.f32 %v228_v49, 0.0 }
 0x11f   :  { %v274_v53 = vpack.c.bf16 %v264_v48, %v263_v52  ;;  %v312_v28 = vsel %vm301_vm2, %v309_v36, %v311_v51 }
 0x120   :  { %2338 = vmatprep.mubr.msk.bf16.mxu1 %vm341_vm3, %v312_v28 }
 0x121   :  { %v313_v58 = vrot.slane %v274_v53, 4 }
 0x123   :  { %v314_v59 = vsel %vm301_vm2, %v311_v51, %v313_v58  ;;  %v316_v60 = vsel %vm301_vm2, %v313_v58, %v315_v56  ;;  %v2590_v51 = vld [vmem:[#allocation2 + $0x150] ss:$8 sps:$4 sm:$0xff]  }
 0x124   :  { %2339 = vmatmul.mubr.msk.bf16.gmra.mrb[16].mxu1 %vm341_vm3, %v314_v59 }
 0x125   :  { %2342 = vmatprep.mubr.msk.bf16.mxu1 %vm341_vm3, %v316_v60 }
 0x12c   :  { %2343 = vmatmul.mubr.msk.bf16.gmra.mrb[20].mxu1 %vm341_vm3, %v315_v56 }
 0x12d   :  { %2354 = vmatprep.mubr.msk.bf16.mxu1 %vm341_vm3, %v2896_v39  ;;  %v267_v39 = vmax.f32 %v2904_v55, 0.0  ;;  %v2584_v55 = vld [vmem:[#allocation2 + $0xc0] ss:$8 sps:$4 sm:$0xff]  }
 0x12f   :  { %v276_v63 = vpack.c.bf16 %v267_v39, %v267_v39 }
 0x134   :  { %2355 = vmatmul.mubr.msk.bf16.vlgmr.msra.gmra.mrb[8].mxu1 %vm341_vm3, %v2906_v57 }
 0x135   :  { %2371 = vmatpush3.bf16.msra.mxu1 %v2577_v33  ;;  %2358 = vmatprep.mubr.msk.bf16.mxu1 %vm341_vm3, %v2914_v6 }
 0x136   :  { %2372 = vmatprep.subr.bf16.mxu1 %v2578_v24 }
 0x139   :  { %2373 = vmatpush3.bf16.msra.mxu1 %v2578_v24 }
 0x13a   :  { %2374 = vmatprep.subr.bf16.mxu1 %v2579_v61 }
 0x13c   :  { %2359 = vmatmul.mubr.msk.bf16.gmra.mrb[12].mxu1 %vm341_vm3, %v2921_v19 }
 0x13d   :  { %2362 = vmatprep.mubr.msk.bf16.mxu1 %vm341_vm3, %v272_v34  ;;  %2375 = vmatpush3.bf16.msra.mxu1 %v2579_v61 }
 0x13e   :  { %2376 = vmatprep.subr.bf16.mxu1 %v2580_v62 }
 0x141   :  { %2377 = vmatpush3.bf16.msra.mxu1 %v2580_v62  ;;  %v2591_v62 = vld [vmem:[#allocation2 + $0x160] ss:$8 sps:$4 sm:$0xff]  }
 0x142   :  { %2430 = vmatprep.subr.bf16.mxu1 %v2740_v0 }
 0x144   :  { %2363 = vmatmul.mubr.msk.bf16.gmra.mrb[16].mxu1 %vm341_vm3, %v273_v47 }
 0x145   :  { %2366 = vmatprep.mubr.msk.bf16.mxu1 %vm341_vm3, %v274_v53 }
 0x14c   :  { %2367 = vmatmul.mubr.msk.bf16.gmra.mrb[24].mxu1 %vm341_vm3, %v2901_v54 }
 0x14d   :  { %2378 = vmatprep.mubr.msk.bf16.mxu1 %vm341_vm3, %v2906_v57  ;;  %v2581_v57 = vld [vmem:[#allocation2 + $0x100] ss:$8 sps:$4 sm:$0xff]  }
 0x14e   :  { %2395 = vmatpush3.bf16.msra.mxu0 %v2581_v57 }
 0x14f   :  { %2396 = vmatprep.subr.bf16.mxu0 %v2740_v0 }
 0x152   :  { %2397 = vmatpush3.bf16.msra.mxu0 %v2582_v1 }
 0x153   :  { %2398 = vmatprep.subr.bf16.mxu0 %v2740_v0 }
 0x154   :  { %2379 = vmatmul.mubr.msk.bf16.vlgmr.msra.gmra.mrb[8].mxu1 %vm341_vm3, %v2914_v6 }
 0x155   :  { %2382 = vmatprep.mubr.msk.bf16.mxu1 %vm341_vm3, %v2921_v19  ;;  %2431 = vmatpush3.bf16.msra.mxu1 %v2584_v55 }
 0x156   :  { %2399 = vmatpush3.bf16.msra.mxu0 %v2583_v2  ;;  %2432 = vmatprep.subr.bf16.mxu1 %v2740_v0 }
 0x157   :  { %2400 = vmatprep.subr.bf16.mxu0 %v2740_v0 }
 0x15a   :  { %2401 = vmatpush3.bf16.msra.mxu0 %v2586_v4 }
 0x15b   :  { %2466 = vmatprep.subr.bf16.mxu0 %v2740_v0 }
 0x15c   :  { %2383 = vmatmul.mubr.msk.bf16.gmra.mrb[12].mxu1 %vm341_vm3, %v272_v34 }
 0x15d   :  { %2386 = vmatprep.mubr.msk.bf16.mxu1 %vm341_vm3, %v273_v47 }
 0x164   :  { %2387 = vmatmul.mubr.msk.bf16.gmra.mrb[16].mxu1 %vm341_vm3, %v274_v53 }
 0x165   :  { %2390 = vmatprep.mubr.msk.bf16.mxu1 %vm341_vm3, %v2901_v54  ;;  %v2585_v54 = vld [vmem:[#allocation2 + $0xd0] ss:$8 sps:$4 sm:$0xff]  }
 0x166   :  { %2433 = vmatpush3.bf16.msra.mxu1 %v2585_v54 }
 0x167   :  { %2434 = vmatprep.subr.bf16.mxu1 %v2740_v0 }
 0x16a   :  { %2435 = vmatpush3.bf16.msra.mxu1 %v2587_v3 }
 0x16b   :  { %2436 = vmatprep.subr.bf16.mxu1 %v2740_v0 }
 0x16c   :  { %2391 = vmatmul.mubr.msk.bf16.gmra.mrb[28].mxu1 %vm341_vm3, %v276_v63 }
 0x16d   :  { %2438 = vmatprep.mubr.msk.bf16.mxu1 %vm2741_vm0, %v2740_v0 }
 0x16e   :  { %2437 = vmatpush3.bf16.msra.mxu1 %v2588_v5  ;;  %v2592_v5 = vld [vmem:[#allocation2 + $0x170] ss:$8 sps:$4 sm:$0xff]  }
 0x1ff   :  { %v2344_v6 = vpop.f32.mrb[20].mxu1 }
 0x200   :  { %v448_v7 = vpop.f32.mrb[21].mxu1 }
 0x201   :  { %v2345_v8 = vpop.f32.mrb[22].mxu1 }
 0x202   :  { %v451_v9 = vpop.f32.mrb[23].mxu1 }
 0x21f   :  { %v2368_v10 = vpop.f32.mrb[24].mxu1 }
 0x220   :  { %v2979_v11 = vadd.f32 %v2368_v10, %v2344_v6  ;;  %v592_v12 = vpop.f32.mrb[25].mxu1 }
 0x221   :  { %v2981_v13 = vadd.f32 %v592_v12, %v448_v7  ;;  %v2369_v14 = vpop.f32.mrb[26].mxu1 }
 0x222   :  { %v595_v15 = vpop.f32.mrb[27].mxu1 }
 0x223   :  { %v2983_v16 = vadd.f32 %v595_v15, %v451_v9 }
 0x227   :  { %v2380_v18 = vpop.f32.mrb[8].mxu1 }
 0x228   :  { %v755_v19 = vadd.f32 %v2380_v18, %v2988_v17  ;;  %v675_v20 = vpop.f32.mrb[9].mxu1 }
 0x229   :  { %v753_v21 = vadd.f32 %v2988_v17, %v675_v20  ;;  %v2381_v22 = vpop.f32.mrb[10].mxu1 }
 0x22a   :  { %v756_v25 = vadd.f32 %v2381_v22, %v2988_v17  ;;  %v678_v26 = vpop.f32.mrb[11].mxu1  ;;  %v770_v29 = vmax.f32 %v755_v19, 0.0 }
 0x22b   :  { %v754_v27 = vadd.f32 %v2988_v17, %v678_v26  ;;  %v768_v23 = vmax.f32 %v753_v21, 0.0 }
 0x22c   :  { %v771_v30 = vmax.f32 %v756_v25, 0.0 }
 0x22d   :  { %v769_v31 = vmax.f32 %v754_v27, 0.0 }
 0x22e   :  { %v2994_v32 = vpack.c.bf16 %v771_v30, %v770_v29 }
 0x22f   :  { %v783_v33 = vpack.c.bf16 %v769_v31, %v768_v23  ;;  %v2384_v34 = vpop.f32.mrb[12].mxu1  ;;  %v2593_v31 = vld [vmem:[#allocation2 + $0x200] ss:$8 sps:$4 sm:$0xff]  }
 0x230   :  { %v815_v35 = vrot.slane %v2994_v32, 4  ;;  %v759_v36 = vadd.f32 %v2384_v34, %v2988_v17  ;;  %v691_v37 = vpop.f32.mrb[13].mxu1  ;;  %v2596_v34 = vld [vmem:[#allocation2 + $0x190] ss:$8 sps:$4 sm:$0xff]  }
 0x231   :  { %v814_v38 = vrot.slane %v783_v33, 4  ;;  %v757_v40 = vadd.f32 %v2988_v17, %v691_v37  ;;  %v2385_v41 = vpop.f32.mrb[14].mxu1  ;;  %2439 = vmatmul.mubr.msk.bf16.vlgmr.msra.gmra.mrb[32].mxu1 %vm341_vm3, %v783_v33  ;;  %v2595_v33 = vld [vmem:[#allocation2 + $0x210] ss:$8 sps:$4 sm:$0xff]  }
 0x232   :  { %v760_v43 = vadd.f32 %v2385_v41, %v2988_v17  ;;  %v694_v44 = vpop.f32.mrb[15].mxu1  ;;  %2442 = vmatprep.mubr.msk.bf16.mxu1 %vm2741_vm0, %v2740_v0  ;;  %v774_v47 = vmax.f32 %v759_v36, 0.0  ;;  %v2598_v36 = vld [vmem:[#allocation2 + $0x1a0] ss:$8 sps:$4 sm:$0xff]   ;;  %v2599_v37 = vld [vmem:[#allocation2 + $0x230] ss:$8 sps:$4 sm:$0xff]  }
 0x233   :  { %v758_v45 = vadd.f32 %v2988_v17, %v694_v44  ;;  %v816_v46 = vsel %vm301_vm2, %v814_v38, %v815_v35  ;;  %v772_v49 = vmax.f32 %v757_v40, 0.0  ;;  %v2600_v38 = vld [vmem:[#allocation2 + $0x1b0] ss:$8 sps:$4 sm:$0xff]   ;;  %v2601_v40 = vld [vmem:[#allocation2 + $0x240] ss:$8 sps:$4 sm:$0xff]  }
 0x234   :  { %v775_v48 = vmax.f32 %v760_v43, 0.0  ;;  %2403 = vmatmul.mubr.msk.bf16.vlgmr.msra.gmra.mrb[28].mxu0 %vm341_vm3, %v816_v46  ;;  %v2602_v41 = vld [vmem:[#allocation2 + $0x1c0] ss:$8 sps:$4 sm:$0xff]   ;;  %v2604_v43 = vld [vmem:[#allocation2 + $0x1d0] ss:$8 sps:$4 sm:$0xff]  }
 0x235   :  { %v773_v50 = vmax.f32 %v758_v45, 0.0  ;;  %2467 = vmatpush3.bf16.msra.mxu0 %v2589_v42  ;;  %2406 = vmatprep.mubr.msk.bf16.mxu0 %vm2741_vm0, %v2740_v0  ;;  %v2603_v42 = vld [vmem:[#allocation2 + $0x250] ss:$8 sps:$4 sm:$0xff]   ;;  %v2605_v44 = vld [vmem:[#allocation2 + $0x260] ss:$8 sps:$4 sm:$0xff]  }
 0x236   :  { %v3008_v52 = vpack.c.bf16 %v775_v48, %v774_v47  ;;  %2468 = vmatprep.subr.bf16.mxu0 %v2740_v0  ;;  %v2606_v45 = vld [vmem:[#allocation2 + $0x1e0] ss:$8 sps:$4 sm:$0xff]   ;;  %v2607_v46 = vld [vmem:[#allocation2 + $0x270] ss:$8 sps:$4 sm:$0xff]  }
 0x237   :  { %v3011_v53 = vpack.c.bf16 %v773_v50, %v772_v49  ;;  %v2388_v56 = vpop.f32.mrb[16].mxu1  ;;  %v2608_v47 = vld [vmem:[#allocation2 + $0x1f0] ss:$8 sps:$4 sm:$0xff]  }
 0x238   :  { %v819_v28 = vrot.slane %v3008_v52, 4  ;;  %v763_v58 = vadd.f32 %v2388_v56, %v2988_v17  ;;  %v707_v59 = vpop.f32.mrb[17].mxu1 }
 0x239   :  { %v817_v60 = vrot.slane %v3011_v53, 4  ;;  %v761_v24 = vadd.f32 %v2988_v17, %v707_v59  ;;  %v2389_v61 = vpop.f32.mrb[18].mxu1  ;;  %2443 = vmatmul.mubr.msk.bf16.gmra.mrb[36].mxu1 %vm341_vm3, %v2994_v32  ;;  %2469 = vmatpush3.bf16.msra.mxu0 %v2590_v51 }
 0x23a   :  { %v764_v39 = vadd.f32 %v2389_v61, %v2988_v17  ;;  %v710_v63 = vpop.f32.mrb[19].mxu1  ;;  %2446 = vmatprep.mubr.msk.bf16.mxu1 %vm2741_vm0, %v2740_v0  ;;  %2470 = vmatprep.subr.bf16.mxu0 %v2740_v0  ;;  %v778_v55 = vmax.f32 %v763_v58, 0.0 }
 0x23b   :  { %v762_v57 = vadd.f32 %v2988_v17, %v710_v63  ;;  %v818_v1 = vsel %vm301_vm2, %v815_v35, %v817_v60  ;;  %v820_v2 = vsel %vm301_vm2, %v817_v60, %v819_v28  ;;  %v776_v3 = vmax.f32 %v761_v24, 0.0  ;;  %v2597_v35 = vld [vmem:[#allocation2 + $0x220] ss:$8 sps:$4 sm:$0xff]  }
 0x23c   :  { %v779_v54 = vmax.f32 %v764_v39, 0.0  ;;  %2407 = vmatmul.mubr.msk.bf16.gmra.mrb[32].mxu0 %vm341_vm3, %v818_v1 }
 0x23d   :  { %v777_v4 = vmax.f32 %v762_v57, 0.0  ;;  %2410 = vmatprep.mubr.msk.bf16.mxu0 %vm2741_vm0, %v2740_v0  ;;  %2471 = vmatpush3.bf16.msra.mxu0 %v2591_v62 }
 0x23e   :  { %v788_v6 = vpack.c.bf16 %v779_v54, %v778_v55  ;;  %2472 = vmatprep.subr.bf16.mxu0 %v2740_v0  ;;  %v2617_v55 = vld [vmem:[#allocation2 + $0x300] ss:$8 sps:$4 sm:$0xff]   ;;  %v2619_v54 = vld [vmem:[#allocation2 + $0x304] ss:$8 sps:$4 sm:$0xff]  }
 0x23f   :  { %v787_v7 = vpack.c.bf16 %v777_v4, %v776_v3  ;;  %v2392_v8 = vpop.f32.mrb[28].mxu1  ;;  %v2622_v4 = vld [vmem:[#allocation2 + $0x314] ss:$8 sps:$4 sm:$0xff]   ;;  %1845 = vmatprep.subr.bf16.mxu1 %v2619_v54 }
 0x240   :  { %v823_v9 = vrot.slane %v788_v6, 4  ;;  %v751_v10 = vadd.f32 %v2392_v8, %v2979_v11  ;;  %v723_v12 = vpop.f32.mrb[29].mxu1  ;;  %1846 = vmatpush1.bf16.msra.mxu1 %v2617_v55  ;;  %v2620_v8 = vld [vmem:[#allocation2 + $0x310] ss:$8 sps:$4 sm:$0xff]  }
 0x241   :  { %v821_v14 = vrot.slane %v787_v7, 4  ;;  %v749_v15 = vadd.f32 %v723_v12, %v2981_v13  ;;  %v2393_v18 = vpop.f32.mrb[30].mxu1  ;;  %2447 = vmatmul.mubr.msk.bf16.gmra.mrb[40].mxu1 %vm341_vm3, %v3011_v53  ;;  %2473 = vmatpush3.bf16.msra.mxu0 %v2592_v5  ;;  %v2625_v12 = vld [vmem:[#allocation2 + $0x324] ss:$8 sps:$4 sm:$0xff]  }
 0x242   :  { %v767_v19 = vadd.f32 %v2988_v17, %v751_v10  ;;  %v726_v20 = vpop.f32.mrb[31].mxu1  ;;  %2450 = vmatprep.mubr.msk.bf16.mxu1 %vm2741_vm0, %v2740_v0  ;;  %2224 = vmatprep.subr.bf16.mxu0 %v2593_v31  ;;  %v2623_v18 = vld [vmem:[#allocation2 + $0x320] ss:$8 sps:$4 sm:$0xff]  }
 0x243   :  { %v765_v21 = vadd.f32 %v2988_v17, %v749_v15  ;;  %v750_v22 = vadd.f32 %v726_v20, %v2983_v16  ;;  %v822_v11 = vsel %vm301_vm2, %v819_v28, %v821_v14  ;;  %v824_v25 = vsel %vm301_vm2, %v821_v14, %v823_v9  ;;  %1847 = vmatprep.subr.bf16.mxu1 %v2622_v4  ;;  %v2628_v20 = vld [vmem:[#allocation2 + $0x334] ss:$8 sps:$4 sm:$0xff]  }
 0x244   :  { %2411 = vmatmul.mubr.msk.bf16.gmra.mrb[36].mxu0 %vm341_vm3, %v820_v2  ;;  %v782_v30 = vmax.f32 %v767_v19, 0.0  ;;  %1848 = vmatpush1.bf16.msra.mxu1 %v2620_v8 }
 0x245   :  { %v766_v13 = vadd.f32 %v2988_v17, %v750_v22  ;;  %2414 = vmatprep.mubr.msk.bf16.mxu0 %vm2741_vm0, %v2740_v0  ;;  %v780_v26 = vmax.f32 %v765_v21, 0.0  ;;  %1849 = vmatprep.subr.bf16.mxu1 %v2625_v12 }
 0x246   :  { %v790_v23 = vpack.c.bf16 %v782_v30, %v782_v30 }
 0x247   :  { %v781_v27 = vmax.f32 %v766_v13, 0.0  ;;  %v2626_v13 = vld [vmem:[#allocation2 + $0x330] ss:$8 sps:$4 sm:$0xff]  }
 0x248   :  { %1850 = vmatpush1.bf16.msra.mxu1 %v2623_v18 }
 0x249   :  { %v789_v29 = vpack.c.bf16 %v781_v27, %v780_v26  ;;  %2451 = vmatmul.mubr.msk.bf16.gmra.mrb[44].mxu1 %vm341_vm3, %v3008_v52  ;;  %1851 = vmatprep.subr.bf16.mxu1 %v2628_v20 }
 0x24a   :  { %2454 = vmatprep.mubr.msk.bf16.mxu1 %vm2741_vm0, %v2740_v0 }
 0x24b   :  { %v825_v16 = vrot.slane %v789_v29, 4 }
 0x24c   :  { %2415 = vmatmul.mubr.msk.bf16.gmra.mrb[40].mxu0 %vm341_vm3, %v822_v11  ;;  %1852 = vmatpush1.bf16.msra.mxu1 %v2626_v13 }
 0x24d   :  { %2418 = vmatprep.mubr.msk.bf16.mxu0 %vm2741_vm0, %v2740_v0  ;;  %v826_v17 = vsel %vm301_vm2, %v823_v9, %v825_v16 }
 0x251   :  { %2455 = vmatmul.mubr.msk.bf16.gmra.mrb[48].mxu1 %vm341_vm3, %v787_v7 }
 0x252   :  { %2458 = vmatprep.mubr.msk.bf16.mxu1 %vm2741_vm0, %v2740_v0 }
 0x254   :  { %2419 = vmatmul.mubr.msk.bf16.gmra.mrb[44].mxu0 %vm341_vm3, %v824_v25 }
 0x255   :  { %2422 = vmatprep.mubr.msk.bf16.mxu0 %vm2741_vm0, %v2740_v0 }
 0x259   :  { %2459 = vmatmul.mubr.msk.bf16.gmra.mrb[52].mxu1 %vm341_vm3, %v788_v6 }
 0x25a   :  { %2462 = vmatprep.mubr.msk.bf16.mxu1 %vm2741_vm0, %v2740_v0 }
 0x25c   :  { %2423 = vmatmul.mubr.msk.bf16.gmra.mrb[48].mxu0 %vm341_vm3, %v826_v17 }
 0x25d   :  { %2426 = vmatprep.mubr.msk.bf16.mxu0 %vm2741_vm0, %v2740_v0 }
 0x261   :  { %2463 = vmatmul.mubr.msk.bf16.gmra.mrb[56].mxu1 %vm341_vm3, %v789_v29 }
 0x264   :  { %2427 = vmatmul.mubr.msk.bf16.gmra.mrb[52].mxu0 %vm341_vm3, %v825_v16 }
 0x265   :  { %2474 = vmatprep.mubr.msk.bf16.mxu0 %vm2741_vm0, %v2740_v0 }
 0x26c   :  { %2475 = vmatmul.mubr.msk.bf16.vlgmr.msra.gmra.mrb[56].mxu0 %vm341_vm3, %v2994_v32  ;;  %v2594_v32 = vld [vmem:[#allocation2 + $0x180] ss:$8 sps:$4 sm:$0xff]  }
 0x26d   :  { %2478 = vmatprep.mubr.msk.bf16.mxu0 %vm2741_vm0, %v2740_v0  ;;  %2225 = vmatpush3.bf16.msra.mxu0 %v2594_v32 }
 0x26e   :  { %2226 = vmatprep.subr.bf16.mxu0 %v2595_v33 }
 0x271   :  { %2227 = vmatpush3.bf16.msra.mxu0 %v2596_v34 }
 0x272   :  { %2228 = vmatprep.subr.bf16.mxu0 %v2597_v35 }
 0x274   :  { %2479 = vmatmul.mubr.msk.bf16.gmra.mrb[60].mxu0 %vm341_vm3, %v3011_v53 }
 0x275   :  { %2482 = vmatprep.mubr.msk.bf16.mxu0 %vm2741_vm0, %v2740_v0  ;;  %2229 = vmatpush3.bf16.msra.mxu0 %v2598_v36 }
 0x276   :  { %2230 = vmatprep.subr.bf16.mxu0 %v2599_v37 }
 0x279   :  { %2231 = vmatpush3.bf16.msra.mxu0 %v2600_v38 }
 0x27a   :  { %2232 = vmatprep.subr.bf16.mxu0 %v2601_v40 }
 0x27c   :  { %2483 = vmatmul.mubr.msk.bf16.gmra.mrb[64].mxu0 %vm341_vm3, %v3008_v52 }
 0x27d   :  { %2486 = vmatprep.mubr.msk.bf16.mxu0 %vm2741_vm0, %v2740_v0  ;;  %2233 = vmatpush3.bf16.msra.mxu0 %v2602_v41 }
 0x27e   :  { %2234 = vmatprep.subr.bf16.mxu0 %v2603_v42 }
 0x281   :  { %2235 = vmatpush3.bf16.msra.mxu0 %v2604_v43 }
 0x282   :  { %2236 = vmatprep.subr.bf16.mxu0 %v2605_v44 }
 0x284   :  { %2487 = vmatmul.mubr.msk.bf16.gmra.mrb[68].mxu0 %vm341_vm3, %v787_v7 }
 0x285   :  { %2490 = vmatprep.mubr.msk.bf16.mxu0 %vm2741_vm0, %v2740_v0  ;;  %2237 = vmatpush3.bf16.msra.mxu0 %v2606_v45 }
 0x286   :  { %2238 = vmatprep.subr.bf16.mxu0 %v2607_v46 }
 0x289   :  { %2239 = vmatpush3.bf16.msra.mxu0 %v2608_v47 }
 0x28a   :  { %2502 = vmatprep.subr.bf16.mxu0 %v2740_v0 }
 0x28c   :  { %2491 = vmatmul.mubr.msk.bf16.gmra.mrb[72].mxu0 %vm341_vm3, %v788_v6 }
 0x28d   :  { %2494 = vmatprep.mubr.msk.bf16.mxu0 %vm2741_vm0, %v2740_v0 }
 0x294   :  { %2495 = vmatmul.mubr.msk.bf16.gmra.mrb[76].mxu0 %vm341_vm3, %v789_v29 }
 0x295   :  { %2498 = vmatprep.mubr.msk.bf16.mxu0 %vm2741_vm0, %v2740_v0 }
 0x29c   :  { %2499 = vmatmul.mubr.msk.bf16.gmra.mrb[80].mxu0 %vm341_vm3, %v790_v23 }
 0x304   :  { %v1033_v48 = vpop.f32.mrb[32].mxu1 }
 0x305   :  { %v2440_v49 = vpop.f32.mrb[33].mxu1 }
 0x306   :  { %v1036_v50 = vpop.f32.mrb[34].mxu1 }
 0x307   :  { %v906_v51 = vpop.f32.mrb[28].mxu0  ;;  %v2441_v52 = vpop.f32.mrb[35].mxu1 }
 0x308   :  { %v3092_v53 = vadd.f32 %v1033_v48, %v906_v51  ;;  %v2404_v56 = vpop.f32.mrb[29].mxu0 }
 0x309   :  { %v909_v28 = vpop.f32.mrb[30].mxu0 }
 0x30a   :  { %v2405_v58 = vpop.f32.mrb[31].mxu0 }
 0x30c   :  { %v1040_v59 = vpop.f32.mrb[36].mxu1 }
 0x30d   :  { %v2444_v60 = vpop.f32.mrb[37].mxu1 }
 0x30e   :  { %v1043_v24 = vpop.f32.mrb[38].mxu1 }
 0x30f   :  { %v913_v61 = vpop.f32.mrb[32].mxu0  ;;  %v2445_v62 = vpop.f32.mrb[39].mxu1 }
 0x310   :  { %v3094_v39 = vadd.f32 %v1040_v59, %v913_v61  ;;  %v2408_v63 = vpop.f32.mrb[33].mxu0 }
 0x311   :  { %v916_v57 = vpop.f32.mrb[34].mxu0  ;;  %v3104_v63 = vld [vmem:[%s3157_s2 + $0x2] ss:$0 sm:$0xff] }
 0x312   :  { %v2409_v1 = vpop.f32.mrb[35].mxu0 }
 0x314   :  { %v1047_v2 = vpop.f32.mrb[40].mxu1 }
 0x315   :  { %v2448_v3 = vpop.f32.mrb[41].mxu1 }
 0x316   :  { %v1050_v5 = vpop.f32.mrb[42].mxu1 }
 0x317   :  { %v920_v6 = vpop.f32.mrb[36].mxu0  ;;  %v2449_v7 = vpop.f32.mrb[43].mxu1 }
 0x318   :  { %v3096_v9 = vadd.f32 %v1047_v2, %v920_v6  ;;  %v2412_v10 = vpop.f32.mrb[37].mxu0 }
 0x319   :  { %v923_v14 = vpop.f32.mrb[38].mxu0 }
 0x31a   :  { %v2413_v15 = vpop.f32.mrb[39].mxu0 }
 0x31c   :  { %v1054_v19 = vpop.f32.mrb[44].mxu1 }
 0x31d   :  { %v2452_v21 = vpop.f32.mrb[45].mxu1 }
 0x31e   :  { %v1057_v22 = vpop.f32.mrb[46].mxu1 }
 0x31f   :  { %v927_v11 = vpop.f32.mrb[40].mxu0  ;;  %v2453_v25 = vpop.f32.mrb[47].mxu1 }
 0x320   :  { %v1055_v26 = vadd.f32 %v1054_v19, %v927_v11  ;;  %v2416_v27 = vpop.f32.mrb[41].mxu0 }
 0x321   :  { %v930_v29 = vpop.f32.mrb[42].mxu0 }
 0x322   :  { %v2417_v16 = vpop.f32.mrb[43].mxu0 }
 0x324   :  { %v1061_v17 = vpop.f32.mrb[48].mxu1 }
 0x325   :  { %v2456_v30 = vpop.f32.mrb[49].mxu1 }
 0x326   :  { %v1064_v23 = vpop.f32.mrb[50].mxu1 }
 0x327   :  { %v934_v31 = vpop.f32.mrb[44].mxu0  ;;  %v2457_v32 = vpop.f32.mrb[51].mxu1  ;;  %v2609_v23 = vld [vmem:[#allocation2 + $0x280] ss:$8 sps:$4 sm:$0xff]  }
 0x328   :  { %v1062_v33 = vadd.f32 %v1061_v17, %v934_v31  ;;  %v2420_v34 = vpop.f32.mrb[45].mxu0 }
 0x329   :  { %v937_v35 = vpop.f32.mrb[46].mxu0 }
 0x32a   :  { %v2421_v36 = vpop.f32.mrb[47].mxu0 }
 0x32c   :  { %v1068_v37 = vpop.f32.mrb[52].mxu1 }
 0x32d   :  { %v2460_v38 = vpop.f32.mrb[53].mxu1 }
 0x32e   :  { %v1071_v40 = vpop.f32.mrb[54].mxu1  ;;  %v2611_v38 = vld [vmem:[#allocation2 + $0x2a0] ss:$8 sps:$4 sm:$0xff]  }
 0x32f   :  { %v941_v41 = vpop.f32.mrb[48].mxu0  ;;  %v2461_v42 = vpop.f32.mrb[55].mxu1 }
 0x330   :  { %v1069_v43 = vadd.f32 %v1068_v37, %v941_v41  ;;  %v2424_v44 = vpop.f32.mrb[49].mxu0 }
 0x331   :  { %v944_v45 = vpop.f32.mrb[50].mxu0 }
 0x332   :  { %v2425_v46 = vpop.f32.mrb[51].mxu0  ;;  %v2612_v45 = vld [vmem:[#allocation2 + $0x2b0] ss:$8 sps:$4 sm:$0xff]  }
 0x334   :  { %v1075_v47 = vpop.f32.mrb[56].mxu1 }
 0x335   :  { %v2464_v48 = vpop.f32.mrb[57].mxu1 }
 0x336   :  { %v1078_v49 = vpop.f32.mrb[58].mxu1 }
 0x337   :  { %v948_v50 = vpop.f32.mrb[52].mxu0  ;;  %v2465_v51 = vpop.f32.mrb[59].mxu1 }
 0x338   :  { %v3098_v52 = vadd.f32 %v1075_v47, %v948_v50  ;;  %v2428_v56 = vpop.f32.mrb[53].mxu0  ;;  %v2613_v51 = vld [vmem:[#allocation2 + $0x2c0] ss:$8 sps:$4 sm:$0xff]  }
 0x339   :  { %v951_v28 = vpop.f32.mrb[54].mxu0 }
 0x33a   :  { %v2429_v58 = vpop.f32.mrb[55].mxu0 }
 0x33b   :  { %v2614_v58 = vld [vmem:[#allocation2 + $0x2d0] ss:$8 sps:$4 sm:$0xff]  }
 0x33f   :  { %v1150_v59 = vpop.f32.mrb[56].mxu0 }
 0x340   :  { %v1198_v60 = vadd.f32 %v1150_v59, %v3092_v53  ;;  %v2476_v24 = vpop.f32.mrb[57].mxu0  ;;  %v2615_v59 = vld [vmem:[#allocation2 + $0x2e0] ss:$8 sps:$4 sm:$0xff]  }
 0x341   :  { %v1153_v61 = vpop.f32.mrb[58].mxu0 }
 0x342   :  { %v2477_v62 = vpop.f32.mrb[59].mxu0  ;;  %v1206_v1 = vadd.f32 %v3104_v63, %v1198_v60 }
 0x343   :  { %v2631_v62 = vld [vmem:[#allocation2 + $0x344] ss:$8 sps:$4 sm:$0xff]  }
 0x344   :  { %v1213_v5 = vmax.f32 %v1206_v1, 0.0  ;;  %1853 = vmatprep.subr.bf16.mxu1 %v2631_v62  ;;  %v2632_v1 = vld [vmem:[#allocation2 + $0x350] ss:$8 sps:$4 sm:$0xff]  }
 0x347   :  { %v1157_v57 = vpop.f32.mrb[60].mxu0 }
 0x348   :  { %v1199_v2 = vadd.f32 %v1157_v57, %v3094_v39  ;;  %v2480_v55 = vpop.f32.mrb[61].mxu0  ;;  %v2629_v57 = vld [vmem:[#allocation2 + $0x340] ss:$8 sps:$4 sm:$0xff]  }
 0x349   :  { %v1160_v54 = vpop.f32.mrb[62].mxu0  ;;  %1854 = vmatpush1.bf16.msra.mxu1 %v2629_v57  ;;  %v2637_v55 = vld [vmem:[#allocation2 + $0x364] ss:$8 sps:$4 sm:$0xff]   ;;  %v2668_v57 = vld [vmem:[#allocation2 + $0x410] ss:$8 sps:$4 sm:$0xff]  }
 0x34a   :  { %v1207_v3 = vadd.f32 %v3104_v63, %v1199_v2  ;;  %v2481_v4 = vpop.f32.mrb[63].mxu0  ;;  %v2634_v2 = vld [vmem:[#allocation2 + $0x354] ss:$8 sps:$4 sm:$0xff]   ;;  %v2635_v54 = vld [vmem:[#allocation2 + $0x360] ss:$8 sps:$4 sm:$0xff]  }
 0x34b   :  { %1855 = vmatprep.subr.bf16.mxu1 %v2634_v2  ;;  %v2641_v4 = vld [vmem:[#allocation2 + $0x380] ss:$8 sps:$4 sm:$0xff]   ;;  %v2673_v2 = vld [vmem:[#allocation2 + $0x424] ss:$8 sps:$4 sm:$0xff]  }
 0x34c   :  { %v1214_v53 = vmax.f32 %v1207_v3, 0.0  ;;  %v2640_v3 = vld [vmem:[#allocation2 + $0x374] ss:$8 sps:$4 sm:$0xff]  }
 0x34d   :  { %1856 = vmatpush1.bf16.msra.mxu1 %v2632_v1  ;;  %v2742_v1 = vmov 0  }
 0x34e   :  { %v1220_v6 = vpack.c.bf16 %v1214_v53, %v1213_v5  ;;  %1857 = vmatprep.subr.bf16.mxu1 %v2637_v55  ;;  %v2644_v5 = vld [vmem:[#allocation2 + $0x390] ss:$8 sps:$4 sm:$0xff]   ;;  %v2646_v53 = vld [vmem:[#allocation2 + $0x394] ss:$8 sps:$4 sm:$0xff]   ;;  %v2671_v55 = vld [vmem:[#allocation2 + $0x420] ss:$8 sps:$4 sm:$0xff]  }
 0x34f   :  { %v1164_v7 = vpop.f32.mrb[64].mxu0 }
 0x350   :  { %v1200_v8 = vadd.f32 %v1164_v7, %v3096_v9  ;;  %v2484_v10 = vpop.f32.mrb[65].mxu0  ;;  %v1227_v17 = vrot.slane %v1220_v6, 4  ;;  %v2647_v7 = vld [vmem:[#allocation2 + $0x3a0] ss:$8 sps:$4 sm:$0xff]  }
 0x351   :  { %v1167_v12 = vpop.f32.mrb[66].mxu0  ;;  %1858 = vmatpush1.bf16.msra.mxu1 %v2635_v54  ;;  %v2652_v10 = vld [vmem:[#allocation2 + $0x3b4] ss:$8 sps:$4 sm:$0xff]  }
 0x352   :  { %v2485_v14 = vpop.f32.mrb[67].mxu0  ;;  %v1208_v18 = vadd.f32 %v3104_v63, %v1200_v8  ;;  %1859 = vmatprep.subr.bf16.mxu1 %v2640_v3  ;;  %v2650_v8 = vld [vmem:[#allocation2 + $0x3b0] ss:$8 sps:$4 sm:$0xff]   ;;  %v2655_v12 = vld [vmem:[#allocation2 + $0x3c4] ss:$8 sps:$4 sm:$0xff]  }
 0x353   :  { %v2653_v14 = vld [vmem:[#allocation2 + $0x3c0] ss:$8 sps:$4 sm:$0xff]   ;;  %v2676_v54 = vld [vmem:[#allocation2 + $0x434] ss:$8 sps:$4 sm:$0xff]   ;;  %v2674_v3 = vld [vmem:[#allocation2 + $0x430] ss:$8 sps:$4 sm:$0xff]  }
 0x354   :  { %v1215_v11 = vmax.f32 %v1208_v18, 0.0  ;;  %v2658_v18 = vld [vmem:[#allocation2 + $0x3d4] ss:$8 sps:$4 sm:$0xff]  }
 0x357   :  { %v1171_v15 = vpop.f32.mrb[68].mxu0 }
 0x358   :  { %v1201_v19 = vadd.f32 %v1171_v15, %v1055_v26  ;;  %v2488_v20 = vpop.f32.mrb[69].mxu0  ;;  %v2610_v26 = vld [vmem:[#allocation2 + $0x290] ss:$8 sps:$4 sm:$0xff]  }
 0x359   :  { %v1174_v39 = vpop.f32.mrb[70].mxu0  ;;  %v2656_v15 = vld [vmem:[#allocation2 + $0x3d0] ss:$8 sps:$4 sm:$0xff]   ;;  %v2659_v20 = vld [vmem:[#allocation2 + $0x3e0] ss:$8 sps:$4 sm:$0xff]  }
 0x35a   :  { %v1209_v21 = vadd.f32 %v3104_v63, %v1201_v19  ;;  %v2489_v22 = vpop.f32.mrb[71].mxu0  ;;  %v2661_v19 = vld [vmem:[#allocation2 + $0x3e4] ss:$8 sps:$4 sm:$0xff]   ;;  %v2664_v39 = vld [vmem:[#allocation2 + $0x3f4] ss:$8 sps:$4 sm:$0xff]  }
 0x35b   :  { %v2667_v22 = vld [vmem:[#allocation2 + $0x404] ss:$8 sps:$4 sm:$0xff]  }
 0x35c   :  { %v1216_v25 = vmax.f32 %v1209_v21, 0.0  ;;  %v2662_v21 = vld [vmem:[#allocation2 + $0x3f0] ss:$8 sps:$4 sm:$0xff]  }
 0x35e   :  { %v1221_v13 = vpack.c.bf16 %v1216_v25, %v1215_v11 }
 0x35f   :  { %v1178_v27 = vpop.f32.mrb[72].mxu0 }
 0x360   :  { %v1202_v29 = vadd.f32 %v1178_v27, %v1062_v33  ;;  %v2492_v16 = vpop.f32.mrb[73].mxu0  ;;  %v1228_v9 = vrot.slane %v1221_v13, 4 }
 0x361   :  { %v1181_v30 = vpop.f32.mrb[74].mxu0 }
 0x362   :  { %v2493_v31 = vpop.f32.mrb[75].mxu0  ;;  %v1229_v32 = vsel %vm301_vm2, %v1227_v17, %v1228_v9  ;;  %v1210_v35 = vadd.f32 %v3104_v63, %v1202_v29 }
 0x363   :  { %1460 = vmatprep.mubr.bf16.mxu0 %v1229_v32 }
 0x364   :  { %1461 = vmatmul.mubr.bf16.vlgmr.msra.gmra.mrb[84].mxu0 %v1220_v6  ;;  %v1217_v42 = vmax.f32 %v1210_v35, 0.0  ;;  %v2649_v6 = vld [vmem:[#allocation2 + $0x3a4] ss:$8 sps:$4 sm:$0xff]  }
 0x365   :  { %2503 = vmatpush3.bf16.msra.mxu0 %v2609_v23 }
 0x366   :  { %2504 = vmatprep.subr.bf16.mxu0 %v2740_v0 }
 0x367   :  { %v1185_v34 = vpop.f32.mrb[76].mxu0 }
 0x368   :  { %v1203_v36 = vadd.f32 %v1185_v34, %v1069_v43  ;;  %v2496_v37 = vpop.f32.mrb[77].mxu0 }
 0x369   :  { %v1188_v33 = vpop.f32.mrb[78].mxu0  ;;  %2505 = vmatpush3.bf16.msra.mxu0 %v2610_v26 }
 0x36a   :  { %v1211_v40 = vadd.f32 %v3104_v63, %v1203_v36  ;;  %v2497_v41 = vpop.f32.mrb[79].mxu0  ;;  %2506 = vmatprep.subr.bf16.mxu0 %v2740_v0  ;;  %v1283_v36 = vld [vmem:[%s3157_s2 + $0x3] ss:$0 sm:$0xff] }
 0x36c   :  { %v1218_v44 = vmax.f32 %v1211_v40, 0.0 }
 0x36d   :  { %2507 = vmatpush3.bf16.msra.mxu0 %v2611_v38 }
 0x36e   :  { %v1222_v46 = vpack.c.bf16 %v1218_v44, %v1217_v42  ;;  %2508 = vmatprep.subr.bf16.mxu0 %v2740_v0 }
 0x36f   :  { %v1192_v47 = vpop.f32.mrb[80].mxu0 }
 0x370   :  { %v1204_v48 = vadd.f32 %v1192_v47, %v3098_v52  ;;  %v2500_v43 = vpop.f32.mrb[81].mxu0  ;;  %v1230_v49 = vrot.slane %v1222_v46, 4  ;;  %v2616_v52 = vld [vmem:[#allocation2 + $0x2f0] ss:$8 sps:$4 sm:$0xff]  }
 0x371   :  { %v1195_v50 = vpop.f32.mrb[82].mxu0  ;;  %2509 = vmatpush3.bf16.msra.mxu0 %v2612_v45 }
 0x372   :  { %v2501_v56 = vpop.f32.mrb[83].mxu0  ;;  %v1231_v28 = vsel %vm301_vm2, %v1228_v9, %v1230_v49  ;;  %2510 = vmatprep.subr.bf16.mxu0 %v2740_v0  ;;  %v1212_v60 = vadd.f32 %v3104_v63, %v1204_v48  ;;  %v2638_v63 = vld [vmem:[#allocation2 + $0x370] ss:$8 sps:$4 sm:$0xff]  }
 0x373   :  { %1467 = vmatprep.mubr.bf16.mxu0 %v1231_v28  ;;  %1860 = vmatpush1.bf16.msra.mxu1 %v2638_v63  ;;  %v2679_v63 = vld [vmem:[#allocation2 + $0x444] ss:$8 sps:$4 sm:$0xff]  }
 0x374   :  { %1468 = vmatmul.mubr.bf16.gmra.mrb[88].mxu0 %v1221_v13  ;;  %v1219_v24 = vmax.f32 %v1212_v60, 0.0 }
 0x375   :  { %1474 = vmatprep.mubr.bf16.mxu0 %v1230_v49  ;;  %2511 = vmatpush3.bf16.msra.mxu0 %v2613_v51 }
 0x376   :  { %2512 = vmatprep.subr.bf16.mxu0 %v2740_v0  ;;  %v1223_v61 = vpack.c.bf16 %v1219_v24, %v1219_v24 }
 0x379   :  { %2513 = vmatpush3.bf16.msra.mxu0 %v2614_v58  ;;  %v2665_v58 = vld [vmem:[#allocation2 + $0x400] ss:$8 sps:$4 sm:$0xff]  }
 0x37a   :  { %2514 = vmatprep.subr.bf16.mxu0 %v2740_v0 }
 0x37c   :  { %1475 = vmatmul.mubr.bf16.gmra.mrb[92].mxu0 %v1222_v46 }
 0x37d   :  { %2515 = vmatpush3.bf16.msra.mxu0 %v2615_v59  ;;  %2518 = vmatprep.mubr.msk.bf16.mxu0 %vm2741_vm0, %v2740_v0 }
 0x37e   :  { %2516 = vmatprep.subr.bf16.mxu0 %v2740_v0 }
 0x381   :  { %2517 = vmatpush3.bf16.msra.mxu0 %v2616_v52  ;;  %v2670_v52 = vld [vmem:[#allocation2 + $0x414] ss:$8 sps:$4 sm:$0xff]  }
 0x384   :  { %2519 = vmatmul.mubr.bf16.vlgmr.msra.gmra.mrb[96].mxu0 %v1221_v13 }
 0x385   :  { %2522 = vmatprep.mubr.msk.bf16.mxu0 %vm2741_vm0, %v2740_v0 }
 0x38c   :  { %2523 = vmatmul.mubr.bf16.gmra.mrb[100].mxu0 %v1222_v46 }
 0x38d   :  { %2526 = vmatprep.mubr.msk.bf16.mxu0 %vm2741_vm0, %v2740_v0  ;;  %v2643_v0 = vld [vmem:[#allocation2 + $0x384] ss:$8 sps:$4 sm:$0xff]  }
 0x38e   :  { %1861 = vmatprep.subr.bf16.mxu1 %v2643_v0  ;;  %v2677_v0 = vld [vmem:[#allocation2 + $0x440] ss:$8 sps:$4 sm:$0xff]  }
 0x38f   :  { %1862 = vmatpush1.bf16.msra.mxu1 %v2641_v4  ;;  %v2682_v4 = vld [vmem:[#allocation2 + $0x454] ss:$8 sps:$4 sm:$0xff]  }
 0x390   :  { %1863 = vmatprep.subr.bf16.mxu1 %v2646_v53  ;;  %v2685_v53 = vld [vmem:[#allocation2 + $0x464] ss:$8 sps:$4 sm:$0xff]  }
 0x393   :  { %1864 = vmatpush1.bf16.msra.mxu1 %v2644_v5  ;;  %v2680_v5 = vld [vmem:[#allocation2 + $0x450] ss:$8 sps:$4 sm:$0xff]  }
 0x394   :  { %2527 = vmatmul.mubr.bf16.gmra.mrb[104].mxu0 %v1223_v61  ;;  %1865 = vmatprep.subr.bf16.mxu1 %v2649_v6  ;;  %v2683_v6 = vld [vmem:[#allocation2 + $0x460] ss:$8 sps:$4 sm:$0xff]  }
 0x397   :  { %1866 = vmatpush1.bf16.msra.mxu1 %v2647_v7  ;;  %v2688_v7 = vld [vmem:[#allocation2 + $0x474] ss:$8 sps:$4 sm:$0xff]  }
 0x398   :  { %1867 = vmatprep.subr.bf16.mxu1 %v2652_v10 }
 0x39b   :  { %1868 = vmatpush1.bf16.msra.mxu1 %v2650_v8  ;;  %v2686_v8 = vld [vmem:[#allocation2 + $0x470] ss:$8 sps:$4 sm:$0xff]  }
 0x39c   :  { %1869 = vmatprep.subr.bf16.mxu1 %v2655_v12 }
 0x39f   :  { %1870 = vmatpush1.bf16.msra.mxu1 %v2653_v14  ;;  %v1595_v14 = vlaneseq }
 0x3a0   :  { %1871 = vmatprep.subr.bf16.mxu1 %v2658_v18 }
 0x3a3   :  { %1872 = vmatpush1.bf16.msra.mxu1 %v2656_v15  ;;  %v1596_v15 = vshrl.u32 %v1595_v14, 7 }
 0x3a4   :  { %1873 = vmatprep.subr.bf16.mxu1 %v2661_v19  ;;  %v2086_v19 = vld [vmem:[%s3157_s2 + $0x4] ss:$8 sm:$0x3] }
 0x3a5   :  { %v1597_v18 = vsub.s32 0, %v1596_v15 }
 0x3a7   :  { %1874 = vmatpush1.bf16.msra.mxu1 %v2659_v20  ;;  %v1601_v20 = vsub.s32 1, %v1596_v15 }
 0x3a8   :  { %1875 = vmatprep.subr.bf16.mxu1 %v2664_v39  ;;  %v1598_v39 = vrot.slane %v2086_v19, %v1597_v18 }
 0x3ab   :  { %1876 = vmatpush1.bf16.msra.mxu1 %v2662_v21  ;;  %v2135_v21 = vld [vmem:[%s3157_s2 + $0x5] ss:$8 sm:$0x3] }
 0x3ac   :  { %1886 = vmatprep.subr.bf16.mxu1 %v2667_v22  ;;  %v1602_v22 = vrot.slane %v2086_v19, %v1601_v20 }
 0x437   :  { %v2240_v11 = vpop.f32.mrb[84].mxu0 }
 0x438   :  { %v2241_v25 = vpop.f32.mrb[85].mxu0 }
 0x439   :  { %v2242_v13 = vadd.f32 %v2241_v25, %v2240_v11  ;;  %v2243_v27 = vpop.f32.mrb[86].mxu0  ;;  %v2136_v25 = vld [vmem:[%s3157_s2 + $0x6] ss:$8 sm:$0x3]  ;;  %s2711_s2 = scalar_lea.vmem %s1968_s20, 256 }
 0x43a   :  { %v2244_v29 = vpop.f32.mrb[87].mxu0  ;;  %v1935_v27 = vrot.slane %v2135_v21, %v1597_v18  ;;  %p2712_p8 = scmp.ne.s32.totalorder %s1968_s20, %s2711_s2  ;;  %p2717_p10 = scmp.lt.s32.totalorder %s2711_s2, %s2711_s2 }
 0x43b   :  { %v1463_v37 = vadd.f32 %v2242_v13, %v1283_v36 }
 0x43c   :  { %p2718_p11 = por %p2717_p10, %p2716_p9 }
 0x43e   :  { %p2719_p12 = pnand %p2718_p11, %p2712_p8 }
 0x447   :  { %v2246_v16 = vpop.f32.mrb[88].mxu0 }
 0x448   :  { %v2247_v17 = vpop.f32.mrb[89].mxu0 }
 0x449   :  { %v2248_v9 = vadd.f32 %v2247_v17, %v2246_v16  ;;  %v2249_v30 = vpop.f32.mrb[90].mxu0  ;;  %v1939_v17 = vrot.slane %v2135_v21, %v1601_v20 }
 0x44a   :  { %v2250_v23 = vpop.f32.mrb[91].mxu0 }
 0x44b   :  { %v1470_v44 = vadd.f32 %v2248_v9, %v1283_v36  ;;  %v1950_v23 = vrot.slane %v2136_v25, %v1597_v18 }
 0x44f   :  { %v2252_v31 = vpop.f32.mrb[92].mxu0 }
 0x450   :  { %v2253_v32 = vpop.f32.mrb[93].mxu0 }
 0x451   :  { %v2254_v26 = vadd.f32 %v2253_v32, %v2252_v31  ;;  %v2255_v34 = vpop.f32.mrb[94].mxu0 }
 0x452   :  { %v2256_v35 = vpop.f32.mrb[95].mxu0 }
 0x453   :  { %v1477_v56 = vadd.f32 %v2254_v26, %v1283_v36  ;;  %v1954_v26 = vrot.slane %v2136_v25, %v1601_v20 }
 0x457   :  { %v1516_v33 = vpop.f32.mrb[96].mxu0 }
 0x458   :  { %v1517_v38 = vadd.f32 %v1516_v33, %v1463_v37  ;;  %v2520_v40 = vpop.f32.mrb[97].mxu0 }
 0x459   :  { %v1519_v41 = vpop.f32.mrb[98].mxu0 }
 0x45a   :  { %v2521_v42 = vpop.f32.mrb[99].mxu0  ;;  %v1536_v43 = vmax.f32 %v1517_v38, 0.0 }
 0x45f   :  { %v1523_v45 = vpop.f32.mrb[100].mxu0 }
 0x460   :  { %v1524_v46 = vadd.f32 %v1523_v45, %v1470_v44  ;;  %v2524_v47 = vpop.f32.mrb[101].mxu0 }
 0x461   :  { %v1526_v48 = vpop.f32.mrb[102].mxu0 }
 0x462   :  { %v1537_v49 = vmax.f32 %v1524_v46, 0.0  ;;  %v2525_v50 = vpop.f32.mrb[103].mxu0 }
 0x464   :  { %v1539_v51 = vpack.c.bf16 %v1537_v49, %v1536_v43 }
 0x466   :  { %v1542_v28 = vrot.slane %v1539_v51, 4 }
 0x467   :  { %v1530_v59 = vpop.f32.mrb[104].mxu0 }
 0x468   :  { %v1531_v60 = vadd.f32 %v1530_v59, %v1477_v56  ;;  %v2528_v24 = vpop.f32.mrb[105].mxu0  ;;  %1877 = vmatprep.mubr.bf16.mxu1 %v1542_v28 }
 0x469   :  { %v1533_v61 = vpop.f32.mrb[106].mxu0  ;;  %1878 = vmatmul.mubr.bf16.vlgmr.msra.gmra.mrb[60].mxu1 %v1539_v51 }
 0x46a   :  { %1887 = vmatpush1.bf16.msra.mxu1 %v2665_v58  ;;  %v2529_v62 = vpop.f32.mrb[107].mxu0  ;;  %1918 = vmatprep.mubr.bf16.mxu1 %v2742_v1  ;;  %v1538_v10 = vmax.f32 %v1531_v60, 0.0 }
 0x46b   :  { %1888 = vmatprep.subr.bf16.mxu1 %v2670_v52 }
 0x46c   :  { %v1540_v12 = vpack.c.bf16 %v1538_v10, %v1538_v10 }
 0x46e   :  { %1889 = vmatpush1.bf16.msra.mxu1 %v2668_v57 }
 0x46f   :  { %1890 = vmatprep.subr.bf16.mxu1 %v2673_v2 }
 0x472   :  { %1891 = vmatpush1.bf16.msra.mxu1 %v2671_v55 }
 0x473   :  { %1892 = vmatprep.subr.bf16.mxu1 %v2676_v54 }
 0x476   :  { %1893 = vmatpush1.bf16.msra.mxu1 %v2674_v3 }
 0x477   :  { %1894 = vmatprep.subr.bf16.mxu1 %v2679_v63 }
 0x47a   :  { %1895 = vmatpush1.bf16.msra.mxu1 %v2677_v0 }
 0x47b   :  { %1896 = vmatprep.subr.bf16.mxu1 %v2682_v4 }
 0x47e   :  { %1897 = vmatpush1.bf16.msra.mxu1 %v2680_v5 }
 0x47f   :  { %1898 = vmatprep.subr.bf16.mxu1 %v2685_v53 }
 0x482   :  { %1899 = vmatpush1.bf16.msra.mxu1 %v2683_v6 }
 0x483   :  { %1900 = vmatprep.subr.bf16.mxu1 %v2688_v7 }
 0x486   :  { %1901 = vmatpush1.bf16.msra.mxu1 %v2686_v8 }
 0x489   :  { %1919 = vmatmul.mubr.bf16.vlgmr.msra.gmra.mrb[60].mxu1 %v1540_v12 }
 0x55c   :  { %v1920_v11 = vpop.f32.mrb[60].mxu1 }
 0x55d   :  { %v2532_v13 = vadd.f32 %v1920_v11, %v1598_v39  ;;  %v1922_v29 = vpop.f32.mrb[61].mxu1 }
 0x55e   :  { %v2533_v16 = vadd.f32 %v1922_v29, %v1602_v22  ;;  %v1924_v9 = vpop.f32.mrb[62].mxu1 }
 0x55f   :  { %v1927_v30 = vmax.f32 %v2532_v13, 0.0  ;;  %v1925_v31 = vpop.f32.mrb[63].mxu1 }
 0x560   :  { %v1928_v32 = vmax.f32 %v2533_v16, 0.0 }
 0x561   :  { %v1942_v34 = vmul.f32 %v1935_v27, %v1927_v30 }
 0x562   :  { %v1943_v35 = vmul.f32 %v1939_v17, %v1928_v32 }
 0x563   :  { %v1957_v36 = vadd.f32 %v1950_v23, %v1942_v34 }
 0x564   :  { %v1958_v37 = vadd.f32 %v1954_v26, %v1943_v35 }
 0x565   :  { %1959 = vst [vmem:[#allocation5] sm:$0xff] %v1957_v36 }
 0x566   :  { %1960 = vst [vmem:[#allocation5 + $0x8] sm:$0xff] %v1958_v37 }
 0x567   :  { %2722 = shalt.err (!%p2719_p12)
}
 0x568   :  { %s2723_s23 = scalar_lea.hbm %s3158_s3, 256 }
 0x569   :  { %p2724_p13 = scmp.ne.s32.totalorder %s3158_s3, %s2723_s23  ;;  %p2727_p0 = scmp.lt.u32.totalorder %s2723_s23, %s3158_s3 }
 0x56b   :  { %p2729_p1 = pnand %p2727_p0, %p2724_p13 }
 0x56d   :  { %2732 = shalt.err (!%p2729_p1)
}
 0x56e   :  { %1970 = dma.vmem_to_hbm [thread:$0]  %s1968_s20, 256, %s3158_s3, [#allocation4]  }
 0x56f   :  { %2735 = dma.done.wait [#allocation4], 256  }
 0x570   :  { %2736 = vsyncadd [#allocation4], 4294967040 }
 0x571   :  { %1974 = vsyncpa [#allocation3], 1 }
 0x572   :  { %1975 = vsyncpa [#allocation4], 1 }

</bundles_post_ra>
